<compile_context>
chip_gen: v7x
topology: tpu7x:2x2x1
jax: 0.10.0
libtpu: 0.0.40
codegen_flags: <defaults>
</compile_context>

<pallas_src>
import functools

import jax
import jax.numpy as jnp
from jax.experimental import pallas as pl
from jax.experimental.pallas import tpu as pltpu

_VMEM_LIMIT = 64 * 1024 * 1024  # explicit scoped-VMEM budget (safe on v5e/v6e/v7x)


def _default_tm():
    """Row-tile size: 256 on v6e/v7x (2x256 MXU), 128 otherwise."""
    try:
        kind = jax.devices()[0].device_kind.lower()
    except Exception:
        return 128
    return 256 if any(t in kind for t in ("v6", "v7", "7x")) else 128


# ----------------------------------------------------------------------------
# Pallas kernels
# ----------------------------------------------------------------------------
def _roi_pool_kernel(bidx_ref, w_ref, f_ref, o_ref, acc_ref):
    # w_ref: (1, P, tk) bf16   f_ref: (1, tk, C) bf16   o_ref: (1, P, C) f32
    @pl.when(pl.program_id(1) == 0)
    def _():
        acc_ref[...] = jnp.zeros_like(acc_ref)

    acc_ref[...] += jnp.dot(w_ref[0], f_ref[0],
                            preferred_element_type=jnp.float32)

    @pl.when(pl.program_id(1) == pl.num_programs(1) - 1)
    def _():
        o_ref[0] = acc_ref[...]


def _mm_affine_kernel(x_ref, w_ref, b_ref, o_ref, *, relu):
    # x: (tm, K) bf16   w: (K, tn) bf16 (BN scale pre-folded)   b: (1, tn) f32
    y = jnp.dot(x_ref[...], w_ref[...], preferred_element_type=jnp.float32)
    y = y + b_ref[...]
    if relu:
        y = jnp.maximum(y, 0.0)
    o_ref[...] = y


def _mm_affine_res_kernel(x_ref, w_ref, b_ref, r_ref, o_ref, *, relu):
    y = jnp.dot(x_ref[...], w_ref[...], preferred_element_type=jnp.float32)
    y = y + b_ref[...] + r_ref[...]
    if relu:
        y = jnp.maximum(y, 0.0)
    o_ref[...] = y


# ----------------------------------------------------------------------------
# Pallas wrappers
# ----------------------------------------------------------------------------
def roi_align_pallas(w_mat, feats_flat, batch_idx, *, tk=2048):
    """pooled[r] = w_mat[r] @ feats_flat[batch_idx[r]] (scalar prefetch, K-tiled)."""
    R, P, HW = w_mat.shape
    N, HW2, C = feats_flat.shape
    assert HW == HW2

    if HW < tk:
        tk = HW
    HWp = pl.cdiv(HW, tk) * tk
    if HWp != HW:
        w_mat = jnp.pad(w_mat, ((0, 0), (0, 0), (0, HWp - HW)))
        feats_flat = jnp.pad(feats_flat, ((0, 0), (0, HWp - HW), (0, 0)))
    nk = HWp // tk

    wb = w_mat.astype(jnp.bfloat16)
    fb = feats_flat.astype(jnp.bfloat16)

    grid_spec = pltpu.PrefetchScalarGridSpec(
        num_scalar_prefetch=1,
        grid=(R, nk),
        in_specs=[
            pl.BlockSpec((1, P, tk), lambda r, k, bidx: (r, 0, k)),
            pl.BlockSpec((1, tk, C), lambda r, k, bidx: (bidx[r], k, 0)),
        ],
        out_specs=pl.BlockSpec((1, P, C), lambda r, k, bidx: (r, 0, 0)),
        scratch_shapes=[pltpu.VMEM((P, C), jnp.float32)],
    )
    cost = pl.CostEstimate(flops=2 * R * P * HWp * C, transcendentals=0,
                           bytes_accessed=wb.size * 2 + fb.size * 2 + R * P * C * 4)
    return pl.pallas_call(
        _roi_pool_kernel,
        grid_spec=grid_spec,
        out_shape=jax.ShapeDtypeStruct((R, P, C), jnp.float32),
        compiler_params=pltpu.CompilerParams(
            dimension_semantics=("parallel", "arbitrary"),
            vmem_limit_bytes=_VMEM_LIMIT),
        cost_estimate=cost,
    )(batch_idx, wb, fb)


def matmul_affine(x2d, w, bias, residual=None, relu=True, tm=None):
    """y = relu?( (x2d @ w) + bias (+ residual) ), bf16 MXU, f32 accumulate.

    Rows padded to a multiple of tm (pl.cdiv grid); columns tiled to <=512
    lanes so wide (2048) outputs keep stores within VMEM/vst budget.
    """
    if tm is None:
        tm = _default_tm()
    M, K = x2d.shape
    K2, N = w.shape
    assert K == K2

    Mp = pl.cdiv(M, tm) * tm
    if Mp != M:
        x2d = jnp.pad(x2d, ((0, Mp - M), (0, 0)))
        if residual is not None:
            residual = jnp.pad(residual, ((0, Mp - M), (0, 0)))

    tn = N if N <= 512 else 512
    assert N % tn == 0

    xb = x2d.astype(jnp.bfloat16)
    wb = w.astype(jnp.bfloat16)
    bias = bias.reshape(1, N).astype(jnp.float32)

    in_specs = [
        pl.BlockSpec((tm, K), lambda i, j: (i, 0)),
        pl.BlockSpec((K, tn), lambda i, j: (0, j)),
        pl.BlockSpec((1, tn), lambda i, j: (0, j)),
    ]
    args = [xb, wb, bias]
    if residual is not None:
        in_specs.append(pl.BlockSpec((tm, tn), lambda i, j: (i, j)))
        args.append(residual.astype(jnp.float32))
        kernel = functools.partial(_mm_affine_res_kernel, relu=relu)
    else:
        kernel = functools.partial(_mm_affine_kernel, relu=relu)

    cost = pl.CostEstimate(flops=2 * Mp * K * N, transcendentals=0,
                           bytes_accessed=xb.size * 2 + wb.size * 2 + Mp * N * 4)
    out = pl.pallas_call(
        kernel,
        grid=(Mp // tm, N // tn),
        in_specs=in_specs,
        out_specs=pl.BlockSpec((tm, tn), lambda i, j: (i, j)),
        out_shape=jax.ShapeDtypeStruct((Mp, N), jnp.float32),
        compiler_params=pltpu.CompilerParams(
            dimension_semantics=("parallel", "parallel"),
            vmem_limit_bytes=_VMEM_LIMIT),
        cost_estimate=cost,
    )(*args)
    return out[:M] if Mp != M else out


# ----------------------------------------------------------------------------
# ROIAlign bilinear weight construction (JAX glue, index math only).
# TODO(synk): at production feature-map sizes replace this dense W_r
# formulation with a gather-based ROIAlign kernel (scalar-prefetch row DMA +
# weighted reduction); the sampling index math itself stays in JAX glue.
# ----------------------------------------------------------------------------
def roi_align_weights(rois, spatial_scale, H, W, pooled, sampling_ratio):
    R = rois.shape[0]
    batch_idx = rois[:, 0].astype(jnp.int32)
    rsw = rois[:, 1] * spatial_scale
    rsh = rois[:, 2] * spatial_scale
    rew = rois[:, 3] * spatial_scale
    reh = rois[:, 4] * spatial_scale
    roi_w = jnp.maximum(rew - rsw, 1.0)
    roi_h = jnp.maximum(reh - rsh, 1.0)
    bin_w = roi_w / pooled
    bin_h = roi_h / pooled
    S = sampling_ratio

    p = jnp.arange(pooled, dtype=jnp.float32)
    s = jnp.arange(S, dtype=jnp.float32)
    # per-roi sample coordinates along each axis: (R, pooled, S)
    ys = rsh[:, None, None] + p[None, :, None] * bin_h[:, None, None] \
        + (s[None, None, :] + 0.5) * bin_h[:, None, None] / S
    xs = rsw[:, None, None] + p[None, :, None] * bin_w[:, None, None] \
        + (s[None, None, :] + 0.5) * bin_w[:, None, None] / S

    # full grid (R, pooled, pooled, S, S)
    Y = jnp.broadcast_to(ys[:, :, None, :, None], (R, pooled, pooled, S, S))
    X = jnp.broadcast_to(xs[:, None, :, None, :], (R, pooled, pooled, S, S))
    valid = (Y >= -1.0) & (Y <= H) & (X >= -1.0) & (X <= W)

    y = jnp.maximum(Y, 0.0)
    x = jnp.maximum(X, 0.0)
    y0 = jnp.floor(y).astype(jnp.int32)
    x0 = jnp.floor(x).astype(jnp.int32)
    y_low = jnp.where(y0 >= H - 1, H - 1, y0)
    y_high = jnp.where(y0 >= H - 1, H - 1, y0 + 1)
    y_adj = jnp.where(y0 >= H - 1, jnp.float32(H - 1), y)
    x_low = jnp.where(x0 >= W - 1, W - 1, x0)
    x_high = jnp.where(x0 >= W - 1, W - 1, x0 + 1)
    x_adj = jnp.where(x0 >= W - 1, jnp.float32(W - 1), x)

    ly = y_adj - y_low.astype(jnp.float32)
    lx = x_adj - x_low.astype(jnp.float32)
    hy = 1.0 - ly
    hx = 1.0 - lx
    w1, w2, w3, w4 = hy * hx, hy * lx, ly * hx, ly * lx

    count = float(S * S)
    vz = valid.astype(jnp.float32) / count
    PP = pooled * pooled
    HW = H * W

    # scatter-add the 4 bilinear corners (no (R,P,S,S,HW) one-hot intermediate)
    idx = jnp.stack([y_low * W + x_low, y_low * W + x_high,
                     y_high * W + x_low, y_high * W + x_high], axis=-1)
    wts = jnp.stack([w1, w2, w3, w4], axis=-1) * vz[..., None]
    idx = idx.reshape(R, PP, S * S * 4)
    wts = wts.reshape(R, PP, S * S * 4)
    r_ix = jnp.arange(R)[:, None, None]
    p_ix = jnp.arange(PP)[None, :, None]
    Wmat = jnp.zeros((R, PP, HW), jnp.float32).at[r_ix, p_ix, idx].add(wts)
    return Wmat, batch_idx


# ----------------------------------------------------------------------------
# res5 head: 3 BottleneckWithFixedBatchNorm blocks (stride 2 on first block,
# stride_in_1x1=True, num_groups=1, dilation=1), conv-as-matmul in Pallas.
# ----------------------------------------------------------------------------
def _im2col3x3(x, stride=1):
    # TODO(synk): fuse the 3x3 tap loop into the matmul kernel (grid axis over
    # the 9 taps + VMEM accumulator) to remove this 9x im2col HBM round trip
    # at production shapes; bf16 input halves the traffic in the meantime.
    N, H, W, C = x.shape
    xp = jnp.pad(x, ((0, 0), (1, 1), (1, 1), (0, 0)))
    H_out = (H + 2 - 3) // stride + 1
    W_out = (W + 2 - 3) // stride + 1
    patches = []
    for ky in range(3):
        for kx in range(3):
            patches.append(
                xp[:, ky:ky + (H_out - 1) * stride + 1:stride,
                   kx:kx + (W_out - 1) * stride + 1:stride, :])
    cols = jnp.stack(patches, axis=3)               # (N, Ho, Wo, 9, C)
    return cols.reshape(N * H_out * W_out, 9 * C), H_out, W_out


def bottleneck_block(x, p, stride, has_down):
    N, H, W, Cin = x.shape
    B = p["w1"].shape[1]
    OUT = p["w3"].shape[1]

    # conv1 (1x1, stride in 1x1) + folded-BN bias + ReLU
    x1 = x[:, ::stride, ::stride, :] if stride > 1 else x
    H1, W1 = x1.shape[1], x1.shape[2]
    out = matmul_affine(x1.reshape(-1, Cin), p["w1"], p["b1"], relu=True)
    out = out.reshape(N, H1, W1, B)

    # conv2 (3x3, stride 1, pad 1) + folded-BN bias + ReLU
    cols, H2, W2 = _im2col3x3(out.astype(jnp.bfloat16), stride=1)
    out = matmul_affine(cols, p["w2"], p["b2"], relu=True)

    # identity / downsample path
    if has_down:
        xd = x[:, ::stride, ::stride, :] if stride > 1 else x
        identity = matmul_affine(xd.reshape(-1, Cin), p["wd"], p["bd"],
                                 relu=False)
    else:
        identity = x.reshape(-1, Cin)

    # conv3 (1x1) + folded-BN bias + residual + ReLU (fused epilogue)
    out = matmul_affine(out, p["w3"], p["b3"], residual=identity, relu=True)
    return out.reshape(N, H2, W2, OUT)


def resnet_head(x, blocks):
    for bi, p in enumerate(blocks):
        stride = 2 if bi == 0 else 1
        x = bottleneck_block(x, p, stride, has_down=(bi == 0))
    return x


def init_head_params(key, c_in, c_b, c_out):
    """Build res5 params; FrozenBN scale is folded into the conv weights."""
    blocks = []
    in_c = c_in
    for bi in range(3):
        ks = jax.random.split(jax.random.fold_in(key, bi), 13)
        w = lambda k, shp: 0.05 * jax.random.normal(k, shp, jnp.float32)
        aff_s = lambda k, n: 1.0 + 0.1 * jax.random.normal(k, (n,), jnp.float32)
        aff_b = lambda k, n: 0.1 * jax.random.normal(k, (n,), jnp.float32)
        p = {}
        # PyTorch layouts: conv1 (c_b, in_c, 1, 1); conv2 (c_b, c_b, 3, 3);
        # conv3 (c_out, c_b, 1, 1); downsample (c_out, in_c, 1, 1)
        w1 = w(ks[0], (c_b, in_c, 1, 1))[:, :, 0, 0].T                # (in_c, c_b)
        s1, b1 = aff_s(ks[1], c_b), aff_b(ks[2], c_b)
        p["w1"], p["b1"] = w1 * s1[None, :], b1
        w2 = jnp.transpose(w(ks[3], (c_b, c_b, 3, 3)),
                           (2, 3, 1, 0)).reshape(9 * c_b, c_b)        # (9*c_b, c_b)
        s2, b2 = aff_s(ks[4], c_b), aff_b(ks[5], c_b)
        p["w2"], p["b2"] = w2 * s2[None, :], b2
        w3 = w(ks[6], (c_out, c_b, 1, 1))[:, :, 0, 0].T               # (c_b, c_out)
        s3, b3 = aff_s(ks[7], c_out), aff_b(ks[8], c_out)
        p["w3"], p["b3"] = w3 * s3[None, :], b3
        if bi == 0:
            wd = w(ks[9], (c_out, in_c, 1, 1))[:, :, 0, 0].T          # (in_c, c_out)
            sd, bd = aff_s(ks[10], c_out), aff_b(ks[11], c_out)
            p["wd"], p["bd"] = wd * sd[None, :], bd
        blocks.append(p)
        in_c = c_out
    return blocks


# ----------------------------------------------------------------------------
# Full extractor forward: pooler(x, proposals) -> head(x)
# ----------------------------------------------------------------------------
def extractor_forward(feats_nchw, rois, head_params, pooled, sampling_ratio,
                      spatial_scale):
    N, C, H, W = feats_nchw.shape
    feats_flat = jnp.transpose(feats_nchw, (0, 2, 3, 1)).reshape(N, H * W, C)
    Wmat, batch_idx = roi_align_weights(rois, spatial_scale, H, W, pooled,
                                        sampling_ratio)
    # Sort ROIs by image so consecutive grid steps reuse the resident feature
    # slab (Pallas skips the DMA when the block index is unchanged).
    order = jnp.argsort(batch_idx)
    inv = jnp.argsort(order)
    pooled_sorted = roi_align_pallas(Wmat[order], feats_flat, batch_idx[order])
    pooled_feats = pooled_sorted[inv]                                 # (R, P, C)
    R = rois.shape[0]
    x = pooled_feats.reshape(R, pooled, pooled, C)                    # NHWC
    x = resnet_head(x, head_params)
    return jnp.transpose(x, (0, 3, 1, 2))                             # NCHW out


if __name__ == "__main__":
    key = jax.random.PRNGKey(0)

    # Small, structure-preserving shapes (real model: C_in=1024, res=14, out=2048)
    N_img, C_in, H, W = 2, 32, 16, 16
    pooled, sampling_ratio, spatial_scale = 4, 2, 0.25
    bottleneck_c, out_c = 16, 64
    num_rois = 6

    k_feat, k_c, k_s, k_p = jax.random.split(key, 4)
    feats = jax.random.normal(k_feat, (N_img, C_in, H, W), jnp.float32)

    # proposals as rois: (batch_idx, x1, y1, x2, y2) in image coords (~64x64)
    img_size = H / spatial_scale
    centers = jax.random.uniform(k_c, (num_rois, 2), minval=8.0,
                                 maxval=img_size - 8.0)
    sizes = jax.random.uniform(k_s, (num_rois, 2), minval=8.0, maxval=24.0)
    x1y1 = jnp.clip(centers - sizes / 2, 0.0, img_size - 1.0)
    x2y2 = jnp.clip(centers + sizes / 2, 1.0, img_size)
    batch_ids = jnp.array([0, 1, 0, 1, 0, 1], jnp.float32)[:, None]
    rois = jnp.concatenate([batch_ids, x1y1, x2y2], axis=1)

    head_params = init_head_params(k_p, C_in, bottleneck_c, out_c)

    fwd = jax.jit(functools.partial(extractor_forward, pooled=pooled,
                                    sampling_ratio=sampling_ratio,
                                    spatial_scale=spatial_scale))
    out = fwd(feats, rois, head_params)
    jax.block_until_ready(out)
    assert out.shape == (num_rois, out_c, pooled // 2, pooled // 2)
    print("KERNEL_OK")
</pallas_src>

<mosaic_0001>
module attributes {stable_mosaic.version = 11 : i64} {
  func.func private @main(%arg0: i32) attributes {dimension_semantics = [#tpu.dimension_semantics<core_parallel>], iteration_bounds = array<i64: 2>, tpu.core_type = #tpu.core_type<sc_scalar_subcore>, window_params = []} {
    return
  }
}

module attributes {stable_mosaic.version = 11 : i64} {
  func.func private @main(%arg0: i32) attributes {dimension_semantics = [#tpu.dimension_semantics<core_parallel>], iteration_bounds = array<i64: 2>, tpu.core_type = #tpu.core_type<sc_scalar_subcore>, window_params = []} {
    return
  }
}

module attributes {stable_mosaic.version = 11 : i64} {
  func.func @_mm_affine_kernel(%arg0: i32, %arg1: i32, %arg2: memref<128x32xbf16, #tpu.memory_space<vmem>>, %arg3: memref<32x16xbf16, #tpu.memory_space<vmem>>, %arg4: memref<1x16xf32, #tpu.memory_space<vmem>>, %arg5: memref<128x16xf32, #tpu.memory_space<vmem>>) attributes {dimension_semantics = [#tpu.dimension_semantics<parallel>, #tpu.dimension_semantics<parallel>], iteration_bounds = array<i64: 1, 1>, scalar_prefetch = 0 : i64, scratch_operands = 0 : i64, tpu.core_type = #tpu.core_type<tc>, window_params = [{transform_indices = @transform_0, window_bounds = array<i64: 128, 32>}, {transform_indices = @transform_1, window_bounds = array<i64: 32, 16>}, {transform_indices = @transform_2, window_bounds = array<i64: 1, 16>}, {transform_indices = @transform_3, window_bounds = array<i64: 128, 16>}]} {
    %c0 = arith.constant 0 : index
    %c0_0 = arith.constant 0 : index
    %0 = vector.load %arg2[%c0, %c0_0] : memref<128x32xbf16, #tpu.memory_space<vmem>>, vector<128x32xbf16>
    %c0_1 = arith.constant 0 : index
    %c0_2 = arith.constant 0 : index
    %1 = vector.load %arg3[%c0_1, %c0_2] : memref<32x16xbf16, #tpu.memory_space<vmem>>, vector<32x16xbf16>
    %cst = arith.constant dense<0.000000e+00> : vector<128x16xf32>
    %2 = tpu.matmul %0, %1, %cst {dimension_numbers = #tpu.dot_dimension_numbers<[1], [0], [0], [1], [0, 0, 1, 1], [], []>} : vector<128x32xbf16>, vector<32x16xbf16>, vector<128x16xf32> -> vector<128x16xf32>
    %c0_3 = arith.constant 0 : index
    %c0_4 = arith.constant 0 : index
    %3 = vector.load %arg4[%c0_3, %c0_4] : memref<1x16xf32, #tpu.memory_space<vmem>>, vector<1x16xf32>
    %4 = vector.broadcast %3 : vector<1x16xf32> to vector<128x16xf32>
    %5 = arith.addf %2, %4 : vector<128x16xf32>
    %cst_5 = arith.constant 0.000000e+00 : f32
    %6 = vector.broadcast %cst_5 : f32 to vector<128x16xf32>
    %7 = arith.maximumf %5, %6 : vector<128x16xf32>
    %c0_6 = arith.constant 0 : index
    %c0_7 = arith.constant 0 : index
    %8 = vector.load %arg5[%c0_6, %c0_7] : memref<128x16xf32, #tpu.memory_space<vmem>>, vector<128x16xf32>
    tpu.vector_store %arg5[%c0_6, %c0_7], %7 {strides = array<i32>} : memref<128x16xf32, #tpu.memory_space<vmem>>, vector<128x16xf32>,
    return
  }
  func.func @transform_0(%arg0: i32, %arg1: i32) -> (i32, i32) {
    %c0_i32 = arith.constant 0 : i32
    %c0_i32_0 = arith.constant 0 : i32
    return %arg0, %c0_i32 : i32, i32
  }
  func.func @transform_1(%arg0: i32, %arg1: i32) -> (i32, i32) {
    %c0_i32 = arith.constant 0 : i32
    %c0_i32_0 = arith.constant 0 : i32
    return %c0_i32, %arg1 : i32, i32
  }
  func.func @transform_2(%arg0: i32, %arg1: i32) -> (i32, i32) {
    %c0_i32 = arith.constant 0 : i32
    %c0_i32_0 = arith.constant 0 : i32
    return %c0_i32, %arg1 : i32, i32
  }
  func.func @transform_3(%arg0: i32, %arg1: i32) -> (i32, i32) {
    %c0_i32 = arith.constant 0 : i32
    return %arg0, %arg1 : i32, i32
  }
}

module attributes {stable_mosaic.version = 11 : i64} {
  func.func @_roi_pool_kernel(%arg0: i32, %arg1: i32, %arg2: memref<6xi32, #tpu.memory_space<smem>>, %arg3: memref<1x16x256xbf16, #tpu.memory_space<vmem>>, %arg4: memref<1x256x32xbf16, #tpu.memory_space<vmem>>, %arg5: memref<1x16x32xf32, #tpu.memory_space<vmem>>, %arg6: memref<16x32xf32, #tpu.memory_space<vmem>>) attributes {dimension_semantics = [#tpu.dimension_semantics<parallel>, #tpu.dimension_semantics<arbitrary>], iteration_bounds = array<i64: 6, 1>, scalar_prefetch = 1 : i64, scratch_operands = 1 : i64, tpu.core_type = #tpu.core_type<tc>, window_params = [{transform_indices = @transform_0, window_bounds = array<i64: 1, 16, 256>}, {transform_indices = @transform_1, window_bounds = array<i64: 1, 256, 32>}, {transform_indices = @transform_2, window_bounds = array<i64: 1, 16, 32>}]} {
    %c0_i32 = arith.constant 0 : i32
    %0 = arith.cmpi eq, %arg1, %c0_i32 : i32
    %1 = arith.extui %0 : i1 to i32
    %c0_i32_0 = arith.constant 0 : i32
    %2 = arith.cmpi ne, %1, %c0_i32_0 : i32
    scf.if %2 {
      %cst_12 = arith.constant 0.000000e+00 : f32
      %14 = vector.broadcast %cst_12 : f32 to vector<16x32xf32>
      %c0_13 = arith.constant 0 : index
      %c0_14 = arith.constant 0 : index
      %15 = vector.load %arg6[%c0_13, %c0_14] : memref<16x32xf32, #tpu.memory_space<vmem>>, vector<16x32xf32>
      tpu.vector_store %arg6[%c0_13, %c0_14], %14 {strides = array<i32>} : memref<16x32xf32, #tpu.memory_space<vmem>>, vector<16x32xf32>,
    } else {
    }
    %c0 = arith.constant 0 : index
    %c0_1 = arith.constant 0 : index
    %3 = vector.load %arg6[%c0, %c0_1] : memref<16x32xf32, #tpu.memory_space<vmem>>, vector<16x32xf32>
    %c0_2 = arith.constant 0 : index
    %c0_3 = arith.constant 0 : index
    %c0_4 = arith.constant 0 : index
    %4 = vector.load %arg3[%c0_2, %c0_3, %c0_4] : memref<1x16x256xbf16, #tpu.memory_space<vmem>>, vector<1x16x256xbf16>
    %5 = vector.shape_cast %4 : vector<1x16x256xbf16> to vector<16x256xbf16>
    %c0_5 = arith.constant 0 : index
    %c0_6 = arith.constant 0 : index
    %c0_7 = arith.constant 0 : index
    %6 = vector.load %arg4[%c0_5, %c0_6, %c0_7] : memref<1x256x32xbf16, #tpu.memory_space<vmem>>, vector<1x256x32xbf16>
    %7 = vector.shape_cast %6 : vector<1x256x32xbf16> to vector<256x32xbf16>
    %cst = arith.constant dense<0.000000e+00> : vector<16x32xf32>
    %8 = tpu.matmul %5, %7, %cst {dimension_numbers = #tpu.dot_dimension_numbers<[1], [0], [0], [1], [0, 0, 1, 1], [], []>} : vector<16x256xbf16>, vector<256x32xbf16>, vector<16x32xf32> -> vector<16x32xf32>
    %9 = arith.addf %3, %8 : vector<16x32xf32>
    %c0_8 = arith.constant 0 : index
    %c0_9 = arith.constant 0 : index
    %10 = vector.load %arg6[%c0_8, %c0_9] : memref<16x32xf32, #tpu.memory_space<vmem>>, vector<16x32xf32>
    tpu.vector_store %arg6[%c0_8, %c0_9], %9 {strides = array<i32>} : memref<16x32xf32, #tpu.memory_space<vmem>>, vector<16x32xf32>,
    %c0_i32_10 = arith.constant 0 : i32
    %11 = arith.cmpi eq, %arg1, %c0_i32_10 : i32
    %12 = arith.extui %11 : i1 to i32
    %c0_i32_11 = arith.constant 0 : i32
    %13 = arith.cmpi ne, %12, %c0_i32_11 : i32
    scf.if %13 {
      %c0_12 = arith.constant 0 : index
      %c0_13 = arith.constant 0 : index
      %14 = vector.load %arg6[%c0_12, %c0_13] : memref<16x32xf32, #tpu.memory_space<vmem>>, vector<16x32xf32>
      %c0_14 = arith.constant 0 : index
      %c0_15 = arith.constant 0 : index
      %c0_16 = arith.constant 0 : index
      %15 = vector.load %arg5[%c0_14, %c0_15, %c0_16] : memref<1x16x32xf32, #tpu.memory_space<vmem>>, vector<1x16x32xf32>
      %16 = vector.shape_cast %15 : vector<1x16x32xf32> to vector<16x32xf32>
      %17 = vector.shape_cast %14 : vector<16x32xf32> to vector<1x16x32xf32>
      tpu.vector_store %arg5[%c0_14, %c0_15, %c0_16], %17 {strides = array<i32>} : memref<1x16x32xf32, #tpu.memory_space<vmem>>, vector<1x16x32xf32>,
    } else {
    }
    return
  }
  func.func @transform_0(%arg0: i32, %arg1: i32, %arg2: memref<6xi32, #tpu.memory_space<smem>>) -> (i32, i32, i32) {
    %c0_i32 = arith.constant 0 : i32
    %c0_i32_0 = arith.constant 0 : i32
    return %arg0, %c0_i32, %arg1 : i32, i32, i32
  }
  func.func @transform_1(%arg0: i32, %arg1: i32, %arg2: memref<6xi32, #tpu.memory_space<smem>>) -> (i32, i32, i32) {
    %0 = arith.index_cast %arg0 : i32 to index
    %1 = memref.load %arg2[%0] : memref<6xi32, #tpu.memory_space<smem>>
    %c0_i32 = arith.constant 0 : i32
    %c0_i32_0 = arith.constant 0 : i32
    return %1, %arg1, %c0_i32 : i32, i32, i32
  }
  func.func @transform_2(%arg0: i32, %arg1: i32, %arg2: memref<6xi32, #tpu.memory_space<smem>>) -> (i32, i32, i32) {
    %c0_i32 = arith.constant 0 : i32
    %c0_i32_0 = arith.constant 0 : i32
    %c0_i32_1 = arith.constant 0 : i32
    return %arg0, %c0_i32, %c0_i32_0 : i32, i32, i32
  }
}

module attributes {stable_mosaic.version = 11 : i64} {
  func.func @_mm_affine_kernel(%arg0: i32, %arg1: i32, %arg2: memref<128x32xbf16, #tpu.memory_space<vmem>>, %arg3: memref<32x64xbf16, #tpu.memory_space<vmem>>, %arg4: memref<1x64xf32, #tpu.memory_space<vmem>>, %arg5: memref<128x64xf32, #tpu.memory_space<vmem>>) attributes {dimension_semantics = [#tpu.dimension_semantics<parallel>, #tpu.dimension_semantics<parallel>], iteration_bounds = array<i64: 1, 1>, scalar_prefetch = 0 : i64, scratch_operands = 0 : i64, tpu.core_type = #tpu.core_type<tc>, window_params = [{transform_indices = @transform_0, window_bounds = array<i64: 128, 32>}, {transform_indices = @transform_1, window_bounds = array<i64: 32, 64>}, {transform_indices = @transform_2, window_bounds = array<i64: 1, 64>}, {transform_indices = @transform_3, window_bounds = array<i64: 128, 64>}]} {
    %c0 = arith.constant 0 : index
    %c0_0 = arith.constant 0 : index
    %0 = vector.load %arg2[%c0, %c0_0] : memref<128x32xbf16, #tpu.memory_space<vmem>>, vector<128x32xbf16>
    %c0_1 = arith.constant 0 : index
    %c0_2 = arith.constant 0 : index
    %1 = vector.load %arg3[%c0_1, %c0_2] : memref<32x64xbf16, #tpu.memory_space<vmem>>, vector<32x64xbf16>
    %cst = arith.constant dense<0.000000e+00> : vector<128x64xf32>
    %2 = tpu.matmul %0, %1, %cst {dimension_numbers = #tpu.dot_dimension_numbers<[1], [0], [0], [1], [0, 0, 1, 1], [], []>} : vector<128x32xbf16>, vector<32x64xbf16>, vector<128x64xf32> -> vector<128x64xf32>
    %c0_3 = arith.constant 0 : index
    %c0_4 = arith.constant 0 : index
    %3 = vector.load %arg4[%c0_3, %c0_4] : memref<1x64xf32, #tpu.memory_space<vmem>>, vector<1x64xf32>
    %4 = vector.broadcast %3 : vector<1x64xf32> to vector<128x64xf32>
    %5 = arith.addf %2, %4 : vector<128x64xf32>
    %c0_5 = arith.constant 0 : index
    %c0_6 = arith.constant 0 : index
    %6 = vector.load %arg5[%c0_5, %c0_6] : memref<128x64xf32, #tpu.memory_space<vmem>>, vector<128x64xf32>
    tpu.vector_store %arg5[%c0_5, %c0_6], %5 {strides = array<i32>} : memref<128x64xf32, #tpu.memory_space<vmem>>, vector<128x64xf32>,
    return
  }
  func.func @transform_0(%arg0: i32, %arg1: i32) -> (i32, i32) {
    %c0_i32 = arith.constant 0 : i32
    %c0_i32_0 = arith.constant 0 : i32
    return %arg0, %c0_i32 : i32, i32
  }
  func.func @transform_1(%arg0: i32, %arg1: i32) -> (i32, i32) {
    %c0_i32 = arith.constant 0 : i32
    %c0_i32_0 = arith.constant 0 : i32
    return %c0_i32, %arg1 : i32, i32
  }
  func.func @transform_2(%arg0: i32, %arg1: i32) -> (i32, i32) {
    %c0_i32 = arith.constant 0 : i32
    %c0_i32_0 = arith.constant 0 : i32
    return %c0_i32, %arg1 : i32, i32
  }
  func.func @transform_3(%arg0: i32, %arg1: i32) -> (i32, i32) {
    %c0_i32 = arith.constant 0 : i32
    return %arg0, %arg1 : i32, i32
  }
}

module attributes {stable_mosaic.version = 11 : i64} {
  func.func @_mm_affine_kernel(%arg0: i32, %arg1: i32, %arg2: memref<128x144xbf16, #tpu.memory_space<vmem>>, %arg3: memref<144x16xbf16, #tpu.memory_space<vmem>>, %arg4: memref<1x16xf32, #tpu.memory_space<vmem>>, %arg5: memref<128x16xf32, #tpu.memory_space<vmem>>) attributes {dimension_semantics = [#tpu.dimension_semantics<parallel>, #tpu.dimension_semantics<parallel>], iteration_bounds = array<i64: 1, 1>, scalar_prefetch = 0 : i64, scratch_operands = 0 : i64, tpu.core_type = #tpu.core_type<tc>, window_params = [{transform_indices = @transform_0, window_bounds = array<i64: 128, 144>}, {transform_indices = @transform_1, window_bounds = array<i64: 144, 16>}, {transform_indices = @transform_2, window_bounds = array<i64: 1, 16>}, {transform_indices = @transform_3, window_bounds = array<i64: 128, 16>}]} {
    %c0 = arith.constant 0 : index
    %c0_0 = arith.constant 0 : index
    %0 = vector.load %arg2[%c0, %c0_0] : memref<128x144xbf16, #tpu.memory_space<vmem>>, vector<128x144xbf16>
    %c0_1 = arith.constant 0 : index
    %c0_2 = arith.constant 0 : index
    %1 = vector.load %arg3[%c0_1, %c0_2] : memref<144x16xbf16, #tpu.memory_space<vmem>>, vector<144x16xbf16>
    %cst = arith.constant dense<0.000000e+00> : vector<128x16xf32>
    %2 = tpu.matmul %0, %1, %cst {dimension_numbers = #tpu.dot_dimension_numbers<[1], [0], [0], [1], [0, 0, 1, 1], [], []>} : vector<128x144xbf16>, vector<144x16xbf16>, vector<128x16xf32> -> vector<128x16xf32>
    %c0_3 = arith.constant 0 : index
    %c0_4 = arith.constant 0 : index
    %3 = vector.load %arg4[%c0_3, %c0_4] : memref<1x16xf32, #tpu.memory_space<vmem>>, vector<1x16xf32>
    %4 = vector.broadcast %3 : vector<1x16xf32> to vector<128x16xf32>
    %5 = arith.addf %2, %4 : vector<128x16xf32>
    %cst_5 = arith.constant 0.000000e+00 : f32
    %6 = vector.broadcast %cst_5 : f32 to vector<128x16xf32>
    %7 = arith.maximumf %5, %6 : vector<128x16xf32>
    %c0_6 = arith.constant 0 : index
    %c0_7 = arith.constant 0 : index
    %8 = vector.load %arg5[%c0_6, %c0_7] : memref<128x16xf32, #tpu.memory_space<vmem>>, vector<128x16xf32>
    tpu.vector_store %arg5[%c0_6, %c0_7], %7 {strides = array<i32>} : memref<128x16xf32, #tpu.memory_space<vmem>>, vector<128x16xf32>,
    return
  }
  func.func @transform_0(%arg0: i32, %arg1: i32) -> (i32, i32) {
    %c0_i32 = arith.constant 0 : i32
    %c0_i32_0 = arith.constant 0 : i32
    return %arg0, %c0_i32 : i32, i32
  }
  func.func @transform_1(%arg0: i32, %arg1: i32) -> (i32, i32) {
    %c0_i32 = arith.constant 0 : i32
    %c0_i32_0 = arith.constant 0 : i32
    return %c0_i32, %arg1 : i32, i32
  }
  func.func @transform_2(%arg0: i32, %arg1: i32) -> (i32, i32) {
    %c0_i32 = arith.constant 0 : i32
    %c0_i32_0 = arith.constant 0 : i32
    return %c0_i32, %arg1 : i32, i32
  }
  func.func @transform_3(%arg0: i32, %arg1: i32) -> (i32, i32) {
    %c0_i32 = arith.constant 0 : i32
    return %arg0, %arg1 : i32, i32
  }
}

module attributes {stable_mosaic.version = 11 : i64} {
  func.func @_mm_affine_res_kernel(%arg0: i32, %arg1: i32, %arg2: memref<128x16xbf16, #tpu.memory_space<vmem>>, %arg3: memref<16x64xbf16, #tpu.memory_space<vmem>>, %arg4: memref<1x64xf32, #tpu.memory_space<vmem>>, %arg5: memref<128x64xf32, #tpu.memory_space<vmem>>, %arg6: memref<128x64xf32, #tpu.memory_space<vmem>>) attributes {dimension_semantics = [#tpu.dimension_semantics<parallel>, #tpu.dimension_semantics<parallel>], iteration_bounds = array<i64: 1, 1>, scalar_prefetch = 0 : i64, scratch_operands = 0 : i64, tpu.core_type = #tpu.core_type<tc>, window_params = [{transform_indices = @transform_0, window_bounds = array<i64: 128, 16>}, {transform_indices = @transform_1, window_bounds = array<i64: 16, 64>}, {transform_indices = @transform_2, window_bounds = array<i64: 1, 64>}, {transform_indices = @transform_3, window_bounds = array<i64: 128, 64>}, {transform_indices = @transform_4, window_bounds = array<i64: 128, 64>}]} {
    %c0 = arith.constant 0 : index
    %c0_0 = arith.constant 0 : index
    %0 = vector.load %arg2[%c0, %c0_0] : memref<128x16xbf16, #tpu.memory_space<vmem>>, vector<128x16xbf16>
    %c0_1 = arith.constant 0 : index
    %c0_2 = arith.constant 0 : index
    %1 = vector.load %arg3[%c0_1, %c0_2] : memref<16x64xbf16, #tpu.memory_space<vmem>>, vector<16x64xbf16>
    %cst = arith.constant dense<0.000000e+00> : vector<128x64xf32>
    %2 = tpu.matmul %0, %1, %cst {dimension_numbers = #tpu.dot_dimension_numbers<[1], [0], [0], [1], [0, 0, 1, 1], [], []>} : vector<128x16xbf16>, vector<16x64xbf16>, vector<128x64xf32> -> vector<128x64xf32>
    %c0_3 = arith.constant 0 : index
    %c0_4 = arith.constant 0 : index
    %3 = vector.load %arg4[%c0_3, %c0_4] : memref<1x64xf32, #tpu.memory_space<vmem>>, vector<1x64xf32>
    %4 = vector.broadcast %3 : vector<1x64xf32> to vector<128x64xf32>
    %5 = arith.addf %2, %4 : vector<128x64xf32>
    %c0_5 = arith.constant 0 : index
    %c0_6 = arith.constant 0 : index
    %6 = vector.load %arg5[%c0_5, %c0_6] : memref<128x64xf32, #tpu.memory_space<vmem>>, vector<128x64xf32>
    %7 = arith.addf %5, %6 : vector<128x64xf32>
    %cst_7 = arith.constant 0.000000e+00 : f32
    %8 = vector.broadcast %cst_7 : f32 to vector<128x64xf32>
    %9 = arith.maximumf %7, %8 : vector<128x64xf32>
    %c0_8 = arith.constant 0 : index
    %c0_9 = arith.constant 0 : index
    %10 = vector.load %arg6[%c0_8, %c0_9] : memref<128x64xf32, #tpu.memory_space<vmem>>, vector<128x64xf32>
    tpu.vector_store %arg6[%c0_8, %c0_9], %9 {strides = array<i32>} : memref<128x64xf32, #tpu.memory_space<vmem>>, vector<128x64xf32>,
    return
  }
  func.func @transform_0(%arg0: i32, %arg1: i32) -> (i32, i32) {
    %c0_i32 = arith.constant 0 : i32
    %c0_i32_0 = arith.constant 0 : i32
    return %arg0, %c0_i32 : i32, i32
  }
  func.func @transform_1(%arg0: i32, %arg1: i32) -> (i32, i32) {
    %c0_i32 = arith.constant 0 : i32
    %c0_i32_0 = arith.constant 0 : i32
    return %c0_i32, %arg1 : i32, i32
  }
  func.func @transform_2(%arg0: i32, %arg1: i32) -> (i32, i32) {
    %c0_i32 = arith.constant 0 : i32
    %c0_i32_0 = arith.constant 0 : i32
    return %c0_i32, %arg1 : i32, i32
  }
  func.func @transform_3(%arg0: i32, %arg1: i32) -> (i32, i32) {
    %c0_i32 = arith.constant 0 : i32
    return %arg0, %arg1 : i32, i32
  }
  func.func @transform_4(%arg0: i32, %arg1: i32) -> (i32, i32) {
    %c0_i32 = arith.constant 0 : i32
    return %arg0, %arg1 : i32, i32
  }
}

module attributes {stable_mosaic.version = 11 : i64} {
  func.func @_mm_affine_kernel(%arg0: i32, %arg1: i32, %arg2: memref<128x64xbf16, #tpu.memory_space<vmem>>, %arg3: memref<64x16xbf16, #tpu.memory_space<vmem>>, %arg4: memref<1x16xf32, #tpu.memory_space<vmem>>, %arg5: memref<128x16xf32, #tpu.memory_space<vmem>>) attributes {dimension_semantics = [#tpu.dimension_semantics<parallel>, #tpu.dimension_semantics<parallel>], iteration_bounds = array<i64: 1, 1>, scalar_prefetch = 0 : i64, scratch_operands = 0 : i64, tpu.core_type = #tpu.core_type<tc>, window_params = [{transform_indices = @transform_0, window_bounds = array<i64: 128, 64>}, {transform_indices = @transform_1, window_bounds = array<i64: 64, 16>}, {transform_indices = @transform_2, window_bounds = array<i64: 1, 16>}, {transform_indices = @transform_3, window_bounds = array<i64: 128, 16>}]} {
    %c0 = arith.constant 0 : index
    %c0_0 = arith.constant 0 : index
    %0 = vector.load %arg2[%c0, %c0_0] : memref<128x64xbf16, #tpu.memory_space<vmem>>, vector<128x64xbf16>
    %c0_1 = arith.constant 0 : index
    %c0_2 = arith.constant 0 : index
    %1 = vector.load %arg3[%c0_1, %c0_2] : memref<64x16xbf16, #tpu.memory_space<vmem>>, vector<64x16xbf16>
    %cst = arith.constant dense<0.000000e+00> : vector<128x16xf32>
    %2 = tpu.matmul %0, %1, %cst {dimension_numbers = #tpu.dot_dimension_numbers<[1], [0], [0], [1], [0, 0, 1, 1], [], []>} : vector<128x64xbf16>, vector<64x16xbf16>, vector<128x16xf32> -> vector<128x16xf32>
    %c0_3 = arith.constant 0 : index
    %c0_4 = arith.constant 0 : index
    %3 = vector.load %arg4[%c0_3, %c0_4] : memref<1x16xf32, #tpu.memory_space<vmem>>, vector<1x16xf32>
    %4 = vector.broadcast %3 : vector<1x16xf32> to vector<128x16xf32>
    %5 = arith.addf %2, %4 : vector<128x16xf32>
    %cst_5 = arith.constant 0.000000e+00 : f32
    %6 = vector.broadcast %cst_5 : f32 to vector<128x16xf32>
    %7 = arith.maximumf %5, %6 : vector<128x16xf32>
    %c0_6 = arith.constant 0 : index
    %c0_7 = arith.constant 0 : index
    %8 = vector.load %arg5[%c0_6, %c0_7] : memref<128x16xf32, #tpu.memory_space<vmem>>, vector<128x16xf32>
    tpu.vector_store %arg5[%c0_6, %c0_7], %7 {strides = array<i32>} : memref<128x16xf32, #tpu.memory_space<vmem>>, vector<128x16xf32>,
    return
  }
  func.func @transform_0(%arg0: i32, %arg1: i32) -> (i32, i32) {
    %c0_i32 = arith.constant 0 : i32
    %c0_i32_0 = arith.constant 0 : i32
    return %arg0, %c0_i32 : i32, i32
  }
  func.func @transform_1(%arg0: i32, %arg1: i32) -> (i32, i32) {
    %c0_i32 = arith.constant 0 : i32
    %c0_i32_0 = arith.constant 0 : i32
    return %c0_i32, %arg1 : i32, i32
  }
  func.func @transform_2(%arg0: i32, %arg1: i32) -> (i32, i32) {
    %c0_i32 = arith.constant 0 : i32
    %c0_i32_0 = arith.constant 0 : i32
    return %c0_i32, %arg1 : i32, i32
  }
  func.func @transform_3(%arg0: i32, %arg1: i32) -> (i32, i32) {
    %c0_i32 = arith.constant 0 : i32
    return %arg0, %arg1 : i32, i32
  }
}

</mosaic_0001>

<bundles_post_ra>
// kernel: extractor_forward.12
= control target key start
LH: loop header
LB: loop body
LE: loop exit
PB: predicated region body
PF: predicated region fallthrough
CT: control target
= control target key end

     0   :  { %8 = vsyncpa [#allocation3], 0  ;;  %s579_s0 = inlined_call_operand.hbm [shape: bf16[128,32], index: 0, kind: input, shape index: {}]   ;;  %s580_s1 = inlined_call_operand.hbm [shape: bf16[32,16], index: 1, kind: input, shape index: {}]   ;;  %s581_s2 = inlined_call_operand.hbm [shape: f32[1,16], index: 2, kind: input, shape index: {}]   ;;  %s582_s3 = inlined_call_operand.hbm [shape: f32[128,16], index: 3, kind: output, shape index: {}]  }
   0x1   :  { %9 = vsyncpa [#allocation6], 0 }
   0x2   :  { %10 = vsyncpa [#allocation4], 0  ;;  %s472_s12 = smov [#allocation5]   ;;  %s473_s14 = smov [#allocation2]  }
   0x3   :  { %s28_s13 = sshll.u32 %s472_s12, 4  ;;  %s16_s15 = sshll.u32 %s473_s14, 4  ;;  %s29_s13 = int_to_ptr.vmem [resolvable:$true] %s28_s13  ;;  %s500_s15 = int_to_ptr.vmem [resolvable:$true] %s16_s15 }
   0x4   :  { %s378_s18 = scalar_lea.hbm %s580_s1, 256 }
   0x5   :  { %p379_p0 = scmp.ne.s32.totalorder %s580_s1, %s378_s18  ;;  %p382_p1 = scmp.lt.u32.totalorder %s378_s18, %s580_s1 }
   0x7   :  { %p384_p2 = pnand %p382_p1, %p379_p0 }
   0x9   :  { %387 = shalt.err (!%p384_p2)
}
   0xa   :  { %s388_s23 = scalar_lea.vmem %s29_s13, 256  ;;  %p393_p4 = scmp.lt.s32.totalorder %s29_s13, %s29_s13 }
   0xb   :  { %p389_p3 = scmp.ne.s32.totalorder %s29_s13, %s388_s23  ;;  %p394_p5 = scmp.lt.s32.totalorder %s388_s23, %s388_s23 }
   0xd   :  { %p395_p6 = por %p394_p5, %p393_p4 }
   0xf   :  { %p396_p7 = pnand %p395_p6, %p389_p3 }
  0x11   :  { %399 = shalt.err (!%p396_p7)
}
  0x12   :  { %s474_s24 = smov 64   ;;  %s475_s25 = smov 4  }
  0x13   :  { %34 = dma.hbm_to_vmem [thread:$0]  %s580_s1, 256, %s29_s13, [#allocation6], %s474_s24, %s474_s24, %s475_s25  }
  0x14   :  { %s400_s30 = scalar_lea.hbm %s579_s0, 1024 }
  0x15   :  { %p401_p8 = scmp.ne.s32.totalorder %s579_s0, %s400_s30  ;;  %p404_p9 = scmp.lt.u32.totalorder %s400_s30, %s579_s0 }
  0x17   :  { %p406_p10 = pnand %p404_p9, %p401_p8 }
  0x19   :  { %409 = shalt.err (!%p406_p10)
}
  0x1a   :  { %s410_s8 = scalar_lea.vmem %s500_s15, 1024  ;;  %p415_p12 = scmp.lt.s32.totalorder %s500_s15, %s500_s15 }
  0x1b   :  { %p411_p11 = scmp.ne.s32.totalorder %s500_s15, %s410_s8  ;;  %p416_p13 = scmp.lt.s32.totalorder %s410_s8, %s410_s8 }
  0x1d   :  { %p417_p0 = por %p416_p13, %p415_p12 }
  0x1f   :  { %p418_p1 = pnand %p417_p0, %p411_p11 }
  0x21   :  { %421 = shalt.err (!%p418_p1)
}
  0x22   :  { %22 = dma.hbm_to_vmem [thread:$0]  %s579_s0, 1024, %s500_s15, [#allocation3], %s474_s24, %s474_s24, %s475_s25  }
  0x23   :  { %s476_s10 = smov [#allocation7]   ;;  %s422_s14 = scalar_lea.hbm %s581_s2, 16 }
  0x24   :  { %s41_s11 = sshll.u32 %s476_s10, 4  ;;  %p423_p2 = scmp.ne.s32.totalorder %s581_s2, %s422_s14  ;;  %s42_s11 = int_to_ptr.vmem [resolvable:$true] %s41_s11 }
  0x25   :  { %p426_p3 = scmp.lt.u32.totalorder %s422_s14, %s581_s2 }
  0x27   :  { %p428_p4 = pnand %p426_p3, %p423_p2 }
  0x29   :  { %431 = shalt.err (!%p428_p4)
}
  0x2a   :  { %s432_s20 = scalar_lea.vmem %s42_s11, 16  ;;  %s436_s0 = scalar_lea.vmem %s42_s11, 32 }
  0x2b   :  { %p433_p5 = scmp.ne.s32.totalorder %s42_s11, %s432_s20  ;;  %p437_p6 = scmp.lt.s32.totalorder %s42_s11, %s42_s11 }
  0x2c   :  { %p438_p7 = scmp.lt.s32.totalorder %s436_s0, %s432_s20 }
  0x2e   :  { %p439_p8 = por %p438_p7, %p437_p6 }
  0x30   :  { %p440_p9 = pnand %p439_p8, %p433_p5 }
  0x32   :  { %443 = shalt.err (!%p440_p9)
}
  0x33   :  { %44 = dma.hbm_to_vmem [thread:$0]  %s581_s2, 16, %s42_s11, [#allocation6]  }
  0x34   :  { %466 = dma.done.wait [#allocation3], 1024  }
  0x35   :  { %467 = vsyncadd [#allocation3], 4294966272 }
  0x36   :  { %468 = dma.done.wait [#allocation6], 272  }
  0x37   :  { %469 = vsyncadd [#allocation6], 4294967024  ;;  %v368_v0 = vld [vmem:[#allocation5] sm:$0xff]   ;;  %v369_v1 = vld [vmem:[#allocation5 + $0x8] sm:$0xff]   ;;  %vm134_vm0 = vcmask 261120   ;;  %vm272_vm1 = vcmask 130048  }
  0x38   :  { %336 = vmatprep.subr.bf16.mxu0 %v368_v0  ;;  %356 = vmatprep.subr.bf16.mxu1 %v368_v0  ;;  %v370_v2 = vld [vmem:[#allocation2] sm:$0xff]   ;;  %v372_v4 = vld [vmem:[#allocation2 + $0x8] sm:$0xff]   ;;  %v374_v6 = vld [vmem:[#allocation2 + $0x10] sm:$0xff]   ;;  %s477_s2 = smov [#allocation8]  }
  0x39   :  { %337 = vmatpush3.bf16.msra.mxu0 %v368_v0  ;;  %358 = vmatpush3.bf16.msra.mxu1 %v368_v0  ;;  %v371_v3 = vld [vmem:[#allocation2 + $0x20] sm:$0xff]   ;;  %v373_v5 = vld [vmem:[#allocation2 + $0x28] sm:$0xff]   ;;  %v375_v7 = vld [vmem:[#allocation2 + $0x30] sm:$0xff]   ;;  %s294_s22 = sshll.u32 %s477_s2, 4  ;;  %s295_s22 = int_to_ptr.vmem [resolvable:$true] %s294_s22 }
  0x3a   :  { %338 = vmatprep.subr.bf16.mxu0 %v369_v1  ;;  %357 = vmatprep.subr.bf16.mxu1 %v369_v1  ;;  %v376_v8 = vld [vmem:[#allocation2 + $0x18] sm:$0xff]   ;;  %v307_v10 = vld [vmem:[#allocation7] ss:$0 sm:$0xff]  ;;  %s444_s23 = scalar_lea.vmem %s295_s22, 2048  ;;  %p449_p11 = scmp.lt.s32.totalorder %s295_s22, %s295_s22 }
  0x3b   :  { %340 = vmatprep.mubr.msk.bf16.mxu0 %vm134_vm0, %v370_v2  ;;  %348 = vmatprep.mubr.msk.bf16.mxu1 %vm134_vm0, %v371_v3  ;;  %v377_v9 = vld [vmem:[#allocation2 + $0x38] sm:$0xff]   ;;  %p445_p10 = scmp.ne.s32.totalorder %s295_s22, %s444_s23  ;;  %p450_p12 = scmp.lt.s32.totalorder %s444_s23, %s444_s23 }
  0x3d   :  { %339 = vmatpush3.bf16.msra.mxu0 %v369_v1  ;;  %359 = vmatpush3.bf16.msra.mxu1 %v369_v1  ;;  %p451_p13 = por %p450_p12, %p449_p11 }
  0x3f   :  { %p452_p0 = pnand %p451_p13, %p445_p10 }
  0x40   :  { %341 = vmatmul.mubr.msk.bf16.vlgmr.msra.gmra.mrb[0].mxu0 %vm134_vm0, %v372_v4  ;;  %349 = vmatmul.mubr.msk.bf16.vlgmr.msra.gmra.mrb[0].mxu1 %vm134_vm0, %v373_v5 }
  0x41   :  { %344 = vmatprep.mubr.msk.bf16.mxu0 %vm134_vm0, %v374_v6  ;;  %352 = vmatprep.mubr.msk.bf16.mxu1 %vm134_vm0, %v375_v7 }
  0x48   :  { %345 = vmatmul.mubr.msk.bf16.gmra.mrb[4].mxu0 %vm134_vm0, %v376_v8  ;;  %353 = vmatmul.mubr.msk.bf16.gmra.mrb[4].mxu1 %vm134_vm0, %v377_v9 }
 0x113   :  { %v342_v11 = vpop.f32.mrb[0].mxu0  ;;  %v350_v12 = vpop.f32.mrb[0].mxu1 }
 0x114   :  { %v202_v13 = vadd.f32 %v342_v11, %v307_v10  ;;  %v234_v14 = vadd.f32 %v350_v12, %v307_v10  ;;  %v193_v15 = vpop.f32.mrb[1].mxu0  ;;  %v225_v16 = vpop.f32.mrb[1].mxu1 }
 0x115   :  { %v194_v17 = vadd.f32 %v307_v10, %v193_v15  ;;  %v226_v18 = vadd.f32 %v307_v10, %v225_v16  ;;  %v343_v19 = vpop.f32.mrb[2].mxu0  ;;  %v351_v20 = vpop.f32.mrb[2].mxu1 }
 0x116   :  { %v258_v21 = vmax.f32 %v202_v13, 0.0  ;;  %v266_v22 = vmax.f32 %v234_v14, 0.0  ;;  %v205_v23 = vadd.f32 %v343_v19, %v307_v10  ;;  %v237_v24 = vadd.f32 %v351_v20, %v307_v10  ;;  %v196_v25 = vpop.f32.mrb[3].mxu0  ;;  %v228_v26 = vpop.f32.mrb[3].mxu1 }
 0x117   :  { %v256_v27 = vmax.f32 %v194_v17, 0.0  ;;  %v264_v28 = vmax.f32 %v226_v18, 0.0  ;;  %v197_v29 = vadd.f32 %v307_v10, %v196_v25  ;;  %v229_v30 = vadd.f32 %v307_v10, %v228_v26 }
 0x118   :  { %275 = vst.msk [vmem:[#allocation8 + $0x10] sm:$0xff] %vm272_vm1, %v258_v21  ;;  %283 = vst.msk [vmem:[#allocation8 + $0x50] sm:$0xff] %vm272_vm1, %v266_v22  ;;  %v259_v31 = vmax.f32 %v205_v23, 0.0  ;;  %v267_v32 = vmax.f32 %v237_v24, 0.0 }
 0x119   :  { %273 = vst.msk [vmem:[#allocation8] sm:$0xff] %vm272_vm1, %v256_v27  ;;  %281 = vst.msk [vmem:[#allocation8 + $0x40] sm:$0xff] %vm272_vm1, %v264_v28  ;;  %v257_v33 = vmax.f32 %v197_v29, 0.0  ;;  %v265_v34 = vmax.f32 %v229_v30, 0.0 }
 0x11a   :  { %276 = vst.msk [vmem:[#allocation8 + $0x18] sm:$0xff] %vm272_vm1, %v259_v31  ;;  %284 = vst.msk [vmem:[#allocation8 + $0x58] sm:$0xff] %vm272_vm1, %v267_v32 }
 0x11b   :  { %274 = vst.msk [vmem:[#allocation8 + $0x8] sm:$0xff] %vm272_vm1, %v257_v33  ;;  %282 = vst.msk [vmem:[#allocation8 + $0x48] sm:$0xff] %vm272_vm1, %v265_v34  ;;  %v346_v35 = vpop.f32.mrb[4].mxu0  ;;  %v354_v36 = vpop.f32.mrb[4].mxu1 }
 0x11c   :  { %v218_v37 = vadd.f32 %v346_v35, %v307_v10  ;;  %v250_v38 = vadd.f32 %v354_v36, %v307_v10  ;;  %v209_v39 = vpop.f32.mrb[5].mxu0  ;;  %v241_v40 = vpop.f32.mrb[5].mxu1 }
 0x11d   :  { %v210_v41 = vadd.f32 %v307_v10, %v209_v39  ;;  %v242_v42 = vadd.f32 %v307_v10, %v241_v40  ;;  %v347_v43 = vpop.f32.mrb[6].mxu0  ;;  %v355_v44 = vpop.f32.mrb[6].mxu1 }
 0x11e   :  { %v262_v45 = vmax.f32 %v218_v37, 0.0  ;;  %v270_v46 = vmax.f32 %v250_v38, 0.0  ;;  %v221_v47 = vadd.f32 %v347_v43, %v307_v10  ;;  %v253_v48 = vadd.f32 %v355_v44, %v307_v10  ;;  %v212_v49 = vpop.f32.mrb[7].mxu0  ;;  %v244_v50 = vpop.f32.mrb[7].mxu1 }
 0x11f   :  { %v260_v51 = vmax.f32 %v210_v41, 0.0  ;;  %v268_v52 = vmax.f32 %v242_v42, 0.0  ;;  %v213_v53 = vadd.f32 %v307_v10, %v212_v49  ;;  %v245_v54 = vadd.f32 %v307_v10, %v244_v50 }
 0x120   :  { %279 = vst.msk [vmem:[#allocation8 + $0x30] sm:$0xff] %vm272_vm1, %v262_v45  ;;  %287 = vst.msk [vmem:[#allocation8 + $0x70] sm:$0xff] %vm272_vm1, %v270_v46  ;;  %v263_v55 = vmax.f32 %v221_v47, 0.0  ;;  %v271_v56 = vmax.f32 %v253_v48, 0.0 }
 0x121   :  { %277 = vst.msk [vmem:[#allocation8 + $0x20] sm:$0xff] %vm272_vm1, %v260_v51  ;;  %285 = vst.msk [vmem:[#allocation8 + $0x60] sm:$0xff] %vm272_vm1, %v268_v52  ;;  %v261_v57 = vmax.f32 %v213_v53, 0.0  ;;  %v269_v58 = vmax.f32 %v245_v54, 0.0 }
 0x122   :  { %280 = vst.msk [vmem:[#allocation8 + $0x38] sm:$0xff] %vm272_vm1, %v263_v55  ;;  %288 = vst.msk [vmem:[#allocation8 + $0x78] sm:$0xff] %vm272_vm1, %v271_v56 }
 0x123   :  { %278 = vst.msk [vmem:[#allocation8 + $0x28] sm:$0xff] %vm272_vm1, %v261_v57  ;;  %286 = vst.msk [vmem:[#allocation8 + $0x68] sm:$0xff] %vm272_vm1, %v269_v58 }
 0x124   :  { %455 = shalt.err (!%p452_p0)
}
 0x125   :  { %s456_s26 = scalar_lea.hbm %s582_s3, 2048 }
 0x126   :  { %p457_p1 = scmp.ne.s32.totalorder %s582_s3, %s456_s26  ;;  %p460_p2 = scmp.lt.u32.totalorder %s456_s26, %s582_s3 }
 0x128   :  { %p462_p3 = pnand %p460_p2, %p457_p1 }
 0x12a   :  { %465 = shalt.err (!%p462_p3)
}
 0x12b   :  { %s478_s4 = smov 128   ;;  %s479_s5 = smov 8  }
 0x12c   :  { %300 = dma.vmem_to_hbm [thread:$0]  %s295_s22, 2048, %s582_s3, [#allocation4], %s478_s4, %s478_s4, %s479_s5  }
 0x12d   :  { %470 = dma.done.wait [#allocation4], 2048  }
 0x12e   :  { %471 = vsyncadd [#allocation4], 4294965248 }
 0x12f   :  { %304 = vsyncpa [#allocation3], 1 }
 0x130   :  { %305 = vsyncpa [#allocation6], 1 }
 0x131   :  { %306 = vsyncpa [#allocation4], 1 }

// kernel: extractor_forward.11
= control target key start
LH: loop header
LB: loop body
LE: loop exit
PB: predicated region body
PF: predicated region fallthrough
CT: control target
= control target key end

     0   :  { %s1304_s0 = inlined_call_operand.hbm [shape: s32[6], index: 0, kind: input, shape index: {}]   ;;  %s1305_s1 = inlined_call_operand.hbm [shape: bf16[6,16,256], index: 1, kind: input, shape index: {}]   ;;  %s1306_s2 = inlined_call_operand.hbm [shape: bf16[2,256,32], index: 2, kind: input, shape index: {}]   ;;  %s1307_s3 = inlined_call_operand.hbm [shape: f32[6,16,32], index: 3, kind: output, shape index: {}]  }
   0x1   :  { %1314 = sst [smem:[#allocation18_spill]] %s1305_s1  ;;  %s744_s14 = scalar_lea.hbm %s1304_s0, 16 }
   0x2   :  { %p745_p0 = scmp.ne.s32.totalorder %s1304_s0, %s744_s14  ;;  %p748_p1 = scmp.lt.u32.totalorder %s744_s14, %s1304_s0 }
   0x4   :  { %p750_p2 = pnand %p748_p1, %p745_p0 }
   0x6   :  { %753 = shalt.err (!%p750_p2)  }
   0x7   :  { %s928_s19 = smov [#allocation4]  }
   0x8   :  { %9 = dma.hbm_to_smem %s1304_s0, 16, %s928_s19, [#allocation3] }
   0x9   :  { %878 = dma.done.wait [#allocation3], 16 }
   0xa   :  { %879 = vsyncadd [#allocation3], 4294967280 }
   0xb   :  { %11 = sfence }
   0xc   :  { %12 = vsyncpa [#allocation6], 0 }
   0xd   :  { %14 = vsyncpa [#allocation6 + $0x1], 0 }
   0xe   :  { %15 = vsyncpa [#allocation9], 0 }
   0xf   :  { %17 = vsyncpa [#allocation9 + $0x1], 0 }
  0x10   :  { %18 = vsyncpa [#allocation7], 0 }
  0x11   :  { %20 = vsyncpa [#allocation7 + $0x1], 0  ;;  %s971_s22 = smov 0   ;;  %s973_s23 = smov 0  }
  0x12   :  { %s975_s24 = smov 0   ;;  %s977_s25 = smov 0  }
  0x13   :  { %s979_s26 = smov 0   ;;  %s981_s0 = smov 0  }
  0x14   :  { %s983_s27 = smov 0   ;;  %s985_s28 = smov 0  }
  0x15   :  { %s987_s29 = smov 0  }
  0x16 LB: > { %s560_s30 = sadd.s32 4294967295, %s926_s29   ;;  %s561_s4 = sadd.s32 4294967294, %s926_s29   ;;  %s926_s29 = sphi %s987_s29, %s26_s29   ;;  %s922_s28 = sphi %s985_s28, %s1343_s28   ;;  %s918_s27 = sphi %s983_s27, %s1342_s27   ;;  %s914_s0 = sphi %s981_s0, %s1341_s0   ;;  %s910_s26 = sphi %s979_s26, %s1340_s26   ;;  %s906_s25 = sphi %s977_s25, %s1339_s25   ;;  %s902_s24 = sphi %s975_s24, %s1338_s24   ;;  %s898_s23 = sphi %s973_s23, %s1337_s23   ;;  %s894_s22 = sphi %s971_s22, %s1336_s22  }
  0x17   : > { %s38_s5 = sadd.s32 1, %s922_s28  ;;  %s47_s6 = sadd.s32 1, %s914_s0 }
  0x18   : > { %p40_p3 = scmp.ge.s32.totalorder %s38_s5, 6  ;;  %p54_p4 = scmp.ne.s32.totalorder %s914_s0, %s910_s26 }
  0x19   : > { %p1309_p5 = scmp.eq.s32.totalorder %s926_s29, 0  ;;  %p60_p6 = scmp.ne.s32.totalorder %s910_s26, %s906_s25 }
  0x1a   : > { %s1345_s5 = smov (%p40_p3, %s38_s5), 0  ;;  %p1036_p8 = scmp.eq.s32.totalorder %s560_s30, 0 }
  0x1b   : > { %1315 = sst [smem:[#allocation17_spill]] %s1345_s5  ;;  %p1032_p7 = por %p1309_p5, %p54_p4 }
  0x1c   : > { %s42_s9 = ssub.s32 %s922_s28, %s1345_s5  ;;  %s1043_s10 = sld [smem:[#allocation4 + %s922_s28]] }
  0x1d   : > { %p45_p9 = scmp.eq.s32.totalorder %s42_s9, 0  ;;  %p1050_p10 = por %p1036_p8, %p60_p6 }
  0x1e   : > { %s1055_s12 = sld [smem:[#allocation4 + %s1345_s5]]  ;;  %p114_p11 = scmp.eq.s32.totalorder %s560_s30, 5 }
  0x1f   : > { %s1318_s11 = scalar_select %p1050_p10, 1, 0 }
  0x20   : > { %s1058_s13 = scalar_select %p45_p9, %s914_s0, %s47_s6  }
  0x21   : > { %p1063_p12 = por %p114_p11, %p54_p4  ;;  %p120_p13 = scmp.eq.s32.totalorder %s561_s4, 5 }
  0x22   : > { %p1308_p0 = scmp.lt.s32.totalorder %s926_s29, 6  ;;  %s140_s16 = sand.u32 1, %s914_s0  }
  0x23   : > { %s1319_s14 = scalar_select %p1063_p12, 1, 0 }
  0x24   : > { %p1071_p1 = por %p120_p13, %p60_p6  ;;  %s564_s17 = sshll.u32 %s140_s16, 4 }
  0x25   : > { %s597_s18 = sshll.u32 %s922_s28, 8  ;;  %s1321_s1 = sld [smem:[#allocation18_spill]] }
  0x26   : > { %s1320_s15 = scalar_select %p1071_p1, 1, 0 }
  0x27   : > { %s144_s30 = scalar_lea.vmem [#allocation5], %s564_s17  ;;  %p1088_p2 = pnand %p1308_p0, %p1032_p7 }
  0x28   : > { %s153_s4 = sshll.u32 %s144_s30, 4  ;;  %s1093_s9 = scalar_lea.sflag [#allocation6], %s140_s16  ;;  %s1082_s4 = int_to_ptr.vmem [resolvable:$true] %s153_s4 }
  0x29   : > { %p756_p6 = pneg %p1088_p2 }
  0x2b   : > { %s1080_s21 = scalar_lea.hbm %s1321_s1, %s597_s18  ;;  %s759_s19 = scalar_lea.hbm %s1321_s1, 1536 }
  0x2c   : > { %s754_s18 = scalar_lea.hbm %s1080_s21, 256  ;;  %p760_p7 = scmp.lt.u32.totalorder %s1080_s21, %s1321_s1 }
  0x2d   : > { %p755_p4 = scmp.ne.s32.totalorder %s1080_s21, %s754_s18  ;;  %p761_p13 = scmp.lt.u32.totalorder %s759_s19, %s754_s18 }
  0x2e   : > { %p763_p5 = scmp.lt.u32.totalorder %s754_s18, %s1080_s21 }
  0x2f   : > { %p757_p9 = pnand %p756_p6, %p755_p4  ;;  %p762_p0 = por %p761_p13, %p760_p7 }
  0x31   : > { %p758_p11 = pneg %p757_p9  ;;  %p764_p3 = por %p763_p5, %p762_p0 }
  0x33   : > { %p765_p1 = pnand %p764_p3, %p758_p11 }
  0x35   : > { %768 = shalt.err (!%p765_p1)
}
  0x36   : > { %s769_s16 = scalar_lea.vmem %s1082_s4, 256  ;;  %s929_s17 = smov [#allocation5]  }
  0x37   : > { %p770_p4 = scmp.ne.s32.totalorder %s1082_s4, %s769_s16  ;;  %s774_s7 = sshll.u32 %s929_s17, 4  ;;  %s775_s7 = int_to_ptr.vmem [resolvable:$false] %s774_s7 }
  0x38   : > { %s776_s20 = scalar_lea.vmem %s775_s7, 512  ;;  %p777_p10 = scmp.lt.s32.totalorder %s1082_s4, %s775_s7 }
  0x39   : > { %p772_p9 = pnand %p770_p4, %p756_p6  ;;  %p778_p7 = scmp.lt.s32.totalorder %s776_s20, %s769_s16 }
  0x3b   : > { %p773_p12 = pneg %p772_p9  ;;  %p779_p13 = por %p778_p7, %p777_p10 }
  0x3d   : > { %p780_p5 = pnand %p779_p13, %p773_p12 }
  0x3f   : > { %783 = shalt.err (!%p780_p5)
}
  0x40   : > { %s930_s18 = smov 128   ;;  %s931_s19 = smov 8  }
  0x41   : > { %633 = dma.hbm_to_vmem [thread:$0]  (!%p1088_p2), %s1080_s21, 256, %s1082_s4, %s1093_s9, %s930_s18, %s930_s18, %s931_s19  }
  0x42   : > { %p185_p10 = scmp.lt.s32.totalorder %s926_s29, 7  ;;  %p1323_p12 = scmp.ge.s32.totalorder %s926_s29, 1 }
  0x43   : > { %s72_s16 = ssub.s32 %s1043_s10, %s1055_s12  ;;  %s77_s17 = sadd.s32 1, %s902_s24 }
  0x44   : > { %p1124_p0 = pnand %p1323_p12, %p185_p10  ;;  %p75_p1 = scmp.eq.s32.totalorder %s72_s16, 0 }
  0x45   : > { %p84_p3 = scmp.ne.s32.totalorder %s902_s24, %s898_s23  ;;  %p90_p6 = scmp.ne.s32.totalorder %s898_s23, %s894_s22 }
  0x46   : > { %s163_s7 = sand.u32 1, %s902_s24   ;;  %p1325_p11 = scmp.eq.s32.totalorder %s926_s29, 0 }
  0x47   : > { %s1137_s20 = scalar_select %p75_p1, %s902_s24, %s77_s17  }
  0x48   : > { %p86_p4 = por %p84_p3, %p1325_p11  ;;  %p1143_p2 = por %p90_p6, %p1036_p8 }
  0x49   : > { %s567_s4 = sshll.u32 %s163_s7, 7  ;;  %p1327_p9 = scmp.lt.s32.totalorder %s926_s29, 6 }
  0x4a   : > { %s1326_s21 = scalar_select %p1143_p2, 1, 0 }
  0x4b   : > { %p1149_p7 = pnand %p1327_p9, %p86_p4  ;;  %p1329_p13 = pmov %p1327_p9 }
  0x4c   : > { %s623_s10 = scalar_select %p86_p4, [#allocation4], [#allocation11] }
  0x4d   : > { %s624_s22 = scalar_select %p86_p4, %s922_s28, 0 }
  0x4e   : > { %s1347_s10 = smov (!%p1329_p13, %s623_s10), [#allocation12]  ;;  %p1330_p5 = pmov %p1327_p9 }
  0x4f   : > { %s167_s8 = scalar_lea.vmem [#allocation8], %s567_s4  ;;  %s1165_s1 = scalar_lea.sflag [#allocation9], %s163_s7 }
  0x50   : > { %s1349_s22 = smov (!%p1330_p5, %s624_s22), 0  ;;  %s177_s9 = sshll.u32 %s167_s8, 4  ;;  %s1158_s9 = int_to_ptr.vmem [resolvable:$true] %s177_s9 }
  0x51   : > { %s168_s12 = sld [smem:[%s1347_s10 + %s1349_s22]]  ;;  %p786_p10 = pneg %p1149_p7 }
  0x52   : > { %s789_s22 = scalar_lea.hbm %s1306_s2, 4096 }
  0x57   : > { %s598_s18 = sshll.u32 %s168_s12, 11 }
  0x58   : > { %s1163_s17 = scalar_lea.hbm %s1306_s2, %s598_s18 }
  0x59   : > { %s784_s5 = scalar_lea.hbm %s1163_s17, 2048  ;;  %p790_p3 = scmp.lt.u32.totalorder %s1163_s17, %s1306_s2 }
  0x5a   : > { %p785_p8 = scmp.ne.s32.totalorder %s1163_s17, %s784_s5  ;;  %p791_p6 = scmp.lt.u32.totalorder %s789_s22, %s784_s5 }
  0x5b   : > { %p793_p4 = scmp.lt.u32.totalorder %s784_s5, %s1163_s17 }
  0x5c   : > { %p787_p12 = pnand %p786_p10, %p785_p8  ;;  %p792_p11 = por %p791_p6, %p790_p3 }
  0x5e   : > { %p788_p1 = pneg %p787_p12  ;;  %p794_p9 = por %p793_p4, %p792_p11 }
  0x60   : > { %p795_p13 = pnand %p794_p9, %p788_p1 }
  0x62   : > { %798 = shalt.err (!%p795_p13)
}
  0x63   : > { %s799_s7 = scalar_lea.vmem %s1158_s9, 2048  ;;  %s932_s18 = smov [#allocation8]  }
  0x64   : > { %p800_p5 = scmp.ne.s32.totalorder %s1158_s9, %s799_s7  ;;  %s804_s19 = sshll.u32 %s932_s18, 4  ;;  %s805_s19 = int_to_ptr.vmem [resolvable:$false] %s804_s19 }
  0x65   : > { %s806_s16 = scalar_lea.vmem %s805_s19, 4096  ;;  %p807_p2 = scmp.lt.s32.totalorder %s1158_s9, %s805_s19 }
  0x66   : > { %p802_p8 = pnand %p800_p5, %p786_p10  ;;  %p808_p3 = scmp.lt.s32.totalorder %s806_s16, %s799_s7 }
  0x68   : > { %p803_p12 = pneg %p802_p8  ;;  %p809_p6 = por %p808_p3, %p807_p2 }
  0x6a   : > { %p810_p11 = pnand %p809_p6, %p803_p12 }
  0x6c   : > { %813 = shalt.err (!%p810_p11)
}
  0x6d   : > { %s933_s5 = smov 64   ;;  %s934_s4 = smov 4  }
  0x6e   : > { %638 = dma.hbm_to_vmem [thread:$0]  (!%p1149_p7), %s1163_s17, 2048, %s1158_s9, %s1165_s1, %s933_s5, %s933_s5, %s934_s4  }
  0x6f   : > { %189 = sbr.rel (%p1124_p0) target bundleno = 398 (0x18e), region = 28  ;;  %s1196_s10 = sand.u32 (!%p1124_p0), 1, %s910_s26  }
  0x70   : > { %s571_s22 = sshll.u32 (!%p1124_p0), %s1196_s10, 4  ;;  %s192_s12 = scalar_lea.sflag (!%p1124_p0), [#allocation6], %s1196_s10 }
  0x71   : > { %s1202_s8 = scalar_lea.vmem (!%p1124_p0), [#allocation5], %s571_s22  ;;  %p1331_p2 = scmp.ne.s32.totalorder (!%p1124_p0), %s1318_s11, 0 }
  0x76   : > { %881 = dma.done.wait (%p1331_p2), %s192_s12, 256  }
  0x77   : > { %883 = vsyncadd (%p1331_p2), %s192_s12, 4294967040  ;;  %s200_s1 = sand.u32 1, %s898_s23   ;;  %p1332_p0 = scmp.ne.s32.totalorder %s1326_s21, 0 }
  0x78   : > { %s572_s30 = sshll.u32 %s200_s1, 7  ;;  %s201_s6 = scalar_lea.sflag [#allocation9], %s200_s1 }
  0x79   : > { %s1209_s9 = scalar_lea.vmem [#allocation8], %s572_s30 }
  0x7a   : > { %885 = dma.done.wait (%p1332_p0), %s201_s6, 2048  }
  0x7b   : > { %887 = vsyncadd (%p1332_p0), %s201_s6, 4294965248  ;;  %v725_v0 = vld [vmem:[%s1209_s9 + $0x40] sm:$0xff]   ;;  %v727_v2 = vld [vmem:[%s1209_s9 + $0x48] sm:$0xff]   ;;  %vm238_vm0 = vcmask 261120   ;;  %v935_v18 = vmov 0.0   ;;  %s599_s11 = sshll.u32 %s918_s27, 8 }
  0x7c   : > { %v726_v1 = vld [vmem:[%s1209_s9] sm:$0xff]   ;;  %600 = vmatprep.subr.bf16.mxu0 %v725_v0  ;;  %v728_v3 = vld [vmem:[%s1209_s9 + $0x8] sm:$0xff]   ;;  %v729_v4 = vld [vmem:[%s1209_s9 + $0x50] sm:$0xff]   ;;  %239 = vst.msk [vmem:[#allocation2] sm:$0xff] %vm238_vm0, %v935_v18  ;;  %s229_s21 = scalar_lea.vmem [#allocation10], %s571_s22  ;;  %s1243_s19 = scalar_lea.hbm %s1307_s3, %s599_s11 }
  0x7d   : > { %601 = vmatpush3.bf16.msra.mxu0 %v726_v1  ;;  %v730_v5 = vld [vmem:[%s1209_s9 + $0x10] sm:$0xff]   ;;  %v731_v6 = vld [vmem:[%s1209_s9 + $0x58] sm:$0xff]   ;;  %v733_v8 = vld [vmem:[%s1209_s9 + $0x60] sm:$0xff]   ;;  %240 = vst.msk [vmem:[#allocation2 + $0x8] sm:$0xff] %vm238_vm0, %v935_v18  ;;  %s450_s17 = sshll.u32 %s229_s21, 4  ;;  %s437_s27 = scalar_lea.sflag [#allocation7], %s1196_s10  ;;  %s1245_s17 = int_to_ptr.vmem [resolvable:$true] %s450_s17 }
  0x7e   : > { %602 = vmatprep.subr.bf16.mxu0 %v727_v2  ;;  %v732_v7 = vld [vmem:[%s1209_s9 + $0x18] sm:$0xff]   ;;  %v734_v9 = vld [vmem:[%s1209_s9 + $0x20] sm:$0xff]   ;;  %v735_v10 = vld [vmem:[%s1209_s9 + $0x68] sm:$0xff]   ;;  %s814_s16 = scalar_lea.vmem %s1245_s17, 256  ;;  %p1333_p10 = scmp.ne.s32.totalorder %s1319_s14, 0 }
  0x7f   : > { %v743_v11 = vld [vmem:[%s1202_s8 + $0x4] ss:$8 sps:$4 sm:$0xff]   ;;  %v741_v17 = vld [vmem:[%s1202_s8] ss:$8 sps:$4 sm:$0xff]   ;;  %p815_p7 = scmp.ne.s32.totalorder %s1245_s17, %s814_s16  ;;  %s936_s5 = smov [#allocation10]  }
  0x80   : > { %v736_v12 = vld [vmem:[%s1209_s9 + $0x28] sm:$0xff]   ;;  %415 = vmatprep.mubr.bf16.mxu0 %v743_v11  ;;  %v737_v13 = vld [vmem:[%s1209_s9 + $0x70] sm:$0xff]   ;;  %v739_v15 = vld [vmem:[%s1209_s9 + $0x78] sm:$0xff]   ;;  %s818_s4 = sshll.u32 %s936_s5, 4  ;;  %s819_s4 = int_to_ptr.vmem [resolvable:$false] %s818_s4 }
  0x81   : > { %603 = vmatpush3.bf16.msra.mxu0 %v728_v3  ;;  %v738_v14 = vld [vmem:[%s1209_s9 + $0x30] sm:$0xff]   ;;  %v740_v16 = vld [vmem:[%s1209_s9 + $0x38] sm:$0xff]   ;;  %p816_p1 = pnand %p815_p7, %p1333_p10  ;;  %s820_s22 = scalar_lea.vmem %s819_s4, 512 }
  0x82   : > { %604 = vmatprep.subr.bf16.mxu0 %v729_v4  ;;  %p821_p9 = scmp.lt.s32.totalorder %s1245_s17, %s819_s4  ;;  %p822_p13 = scmp.lt.s32.totalorder %s820_s22, %s814_s16 }
  0x83   : > { %v241_v20 = vld [vmem:[#allocation2] sm:$0xff]  ;;  %p817_p4 = pneg %p816_p1 }
  0x84   : > { %v242_v24 = vld [vmem:[#allocation2 + $0x8] sm:$0xff]  ;;  %p823_p5 = por %p822_p13, %p821_p9 }
  0x85   : > { %605 = vmatpush3.bf16.msra.mxu0 %v730_v5 }
  0x86   : > { %606 = vmatprep.subr.bf16.mxu0 %v731_v6  ;;  %p824_p8 = pnand %p823_p5, %p817_p4 }
  0x89   : > { %607 = vmatpush3.bf16.msra.mxu0 %v732_v7 }
  0x8a   : > { %608 = vmatprep.subr.bf16.mxu0 %v733_v8 }
  0x8d   : > { %609 = vmatpush3.bf16.msra.mxu0 %v734_v9 }
  0x8e   : > { %610 = vmatprep.subr.bf16.mxu0 %v735_v10 }
  0x91   : > { %611 = vmatpush3.bf16.msra.mxu0 %v736_v12 }
  0x92   : > { %612 = vmatprep.subr.bf16.mxu0 %v737_v13 }
  0x95   : > { %613 = vmatpush3.bf16.msra.mxu0 %v738_v14 }
  0x96   : > { %614 = vmatprep.subr.bf16.mxu0 %v739_v15 }
  0x99   : > { %615 = vmatpush3.bf16.msra.mxu0 %v740_v16 }
  0x9c   : > { %416 = vmatmul.mubr.bf16.vlgmr.msra.gmra.mrb[0].mxu0 %v741_v17 }
 0x16f   : > { %v616_v19 = vpop.f32.mrb[0].mxu0 }
 0x170   : > { %v617_v21 = vpop.f32.mrb[1].mxu0 }
 0x171   : > { %v618_v22 = vadd.f32 %v617_v21, %v616_v19  ;;  %v619_v23 = vpop.f32.mrb[2].mxu0 }
 0x172   : > { %v620_v25 = vpop.f32.mrb[3].mxu0 }
 0x173   : > { %v424_v26 = vadd.f32 %v618_v22, %v241_v20  ;;  %v621_v27 = vadd.f32 %v620_v25, %v619_v23 }
 0x175   : > { %427 = vst.msk [vmem:[#allocation2] sm:$0xff] %vm238_vm0, %v424_v26  ;;  %v425_v28 = vadd.f32 %v621_v27, %v242_v24 }
 0x177   : > { %428 = vst.msk [vmem:[#allocation2 + $0x8] sm:$0xff] %vm238_vm0, %v425_v28 }
 0x17c   : > { %v432_v29 = vld [vmem:[#allocation2] sm:$0xff] }
 0x17d   : > { %434 = vst.msk [vmem:[%s229_s21] sm:$0xff] %vm238_vm0, %v432_v29 }
 0x17e   : > { %v433_v30 = vld [vmem:[#allocation2 + $0x8] sm:$0xff] }
 0x17f   : > { %435 = vst.msk [vmem:[%s229_s21 + $0x8] sm:$0xff] %vm238_vm0, %v433_v30 }
 0x180   : > { %827 = shalt.err (!%p824_p8)
}
 0x181   : > { %s828_s12 = scalar_lea.hbm %s1243_s19, 256  ;;  %s832_s30 = scalar_lea.hbm %s1307_s3, 1536 }
 0x182   : > { %p829_p12 = scmp.ne.s32.totalorder %s1243_s19, %s828_s12  ;;  %p833_p11 = scmp.lt.u32.totalorder %s1243_s19, %s1307_s3 }
 0x183   : > { %p834_p2 = scmp.lt.u32.totalorder %s832_s30, %s828_s12  ;;  %p836_p7 = scmp.lt.u32.totalorder %s828_s12, %s1243_s19 }
 0x184   : > { %p830_p3 = pnand %p829_p12, %p1333_p10 }
 0x185   : > { %p835_p0 = por %p834_p2, %p833_p11 }
 0x186   : > { %p831_p6 = pneg %p830_p3 }
 0x187   : > { %p837_p1 = por %p836_p7, %p835_p0 }
 0x189   : > { %p838_p4 = pnand %p837_p1, %p831_p6 }
 0x18b   : > { %841 = shalt.err (!%p838_p4)
}
 0x18c   : > { %s937_s11 = smov 128   ;;  %s938_s21 = smov 8  }
 0x18d   : > { %628 = dma.vmem_to_hbm [thread:$0]  (%p1333_p10), %s1245_s17, 256, %s1243_s19, %s437_s27, %s937_s11, %s937_s11, %s938_s21  }
 0x18e PF: > { %p644_p9 = scmp.ge.s32.totalorder %s926_s29, 2  ;;  %s465_s7 = sand.u32 1, %s906_s25  }
 0x18f   : > { %p1334_p13 = scmp.ne.s32.totalorder %s1320_s15, 0  ;;  %s466_s18 = scalar_lea.sflag [#allocation7], %s465_s7 }
 0x191   : > { %p640_p5 = pnand %p644_p9, %p1334_p13 }
 0x193   : > { %889 = dma.done.wait (!%p640_p5), %s466_s18, 256  }
 0x194   : > { %891 = vsyncadd (!%p640_p5), %s466_s18, 4294967040  ;;  %s26_s29 = sadd.s32 1, %s926_s29   ;;  %s1335_s14 = sld [smem:[#allocation17_spill]] }
 0x195   : > { %p23_p8 = scmp.ge.s32.totalorder %s26_s29, 8   ;;  %s1336_s22 = smov %s898_s23 }
 0x196   : > { %s1337_s23 = smov %s902_s24  ;;  %s1338_s24 = smov %s1137_s20 }
 0x197   : > { %s1339_s25 = smov %s910_s26  ;;  %s1340_s26 = smov %s914_s0 }
 0x198   : > { %s1341_s0 = smov %s1058_s13  ;;  %s1342_s27 = smov %s922_s28 }
 0x199   :  { %25 = sbr.rel (!%p23_p8) target bundleno = 22 (0x16), region = 94 }
 0x19a   : > { %s1343_s28 = smov %s1335_s14 }
 0x1a0   :  { %471 = vsyncpa [#allocation6], 1 }
 0x1a1   :  { %473 = vsyncpa [#allocation6 + $0x1], 1 }
 0x1a2   :  { %474 = vsyncpa [#allocation9], 1 }
 0x1a3   :  { %476 = vsyncpa [#allocation9 + $0x1], 1 }
 0x1a4   :  { %477 = vsyncpa [#allocation7], 1 }
 0x1a5   :  { %479 = vsyncpa [#allocation7 + $0x1], 1 }

// kernel: extractor_forward.14
= control target key start
LH: loop header
LB: loop body
LE: loop exit
PB: predicated region body
PF: predicated region fallthrough
CT: control target
= control target key end

     0   :  { %8 = vsyncpa [#allocation3], 0  ;;  %s563_s0 = inlined_call_operand.hbm [shape: bf16[128,32], index: 0, kind: input, shape index: {}]   ;;  %s564_s1 = inlined_call_operand.hbm [shape: bf16[32,64], index: 1, kind: input, shape index: {}]   ;;  %s565_s2 = inlined_call_operand.hbm [shape: f32[1,64], index: 2, kind: input, shape index: {}]   ;;  %s566_s3 = inlined_call_operand.hbm [shape: f32[128,64], index: 3, kind: output, shape index: {}]  }
   0x1   :  { %9 = vsyncpa [#allocation6], 0 }
   0x2   :  { %10 = vsyncpa [#allocation4], 0  ;;  %s456_s12 = smov [#allocation5]   ;;  %s457_s14 = smov [#allocation2]  }
   0x3   :  { %s28_s13 = sshll.u32 %s456_s12, 4  ;;  %s16_s15 = sshll.u32 %s457_s14, 4  ;;  %s29_s13 = int_to_ptr.vmem [resolvable:$true] %s28_s13  ;;  %s484_s15 = int_to_ptr.vmem [resolvable:$true] %s16_s15 }
   0x4   :  { %s362_s18 = scalar_lea.hbm %s564_s1, 256 }
   0x5   :  { %p363_p0 = scmp.ne.s32.totalorder %s564_s1, %s362_s18  ;;  %p366_p1 = scmp.lt.u32.totalorder %s362_s18, %s564_s1 }
   0x7   :  { %p368_p2 = pnand %p366_p1, %p363_p0 }
   0x9   :  { %371 = shalt.err (!%p368_p2)
}
   0xa   :  { %s372_s23 = scalar_lea.vmem %s29_s13, 256  ;;  %p377_p4 = scmp.lt.s32.totalorder %s29_s13, %s29_s13 }
   0xb   :  { %p373_p3 = scmp.ne.s32.totalorder %s29_s13, %s372_s23  ;;  %p378_p5 = scmp.lt.s32.totalorder %s372_s23, %s372_s23 }
   0xd   :  { %p379_p6 = por %p378_p5, %p377_p4 }
   0xf   :  { %p380_p7 = pnand %p379_p6, %p373_p3 }
  0x11   :  { %383 = shalt.err (!%p380_p7)
}
  0x12   :  { %s458_s24 = smov 64   ;;  %s459_s25 = smov 4  }
  0x13   :  { %34 = dma.hbm_to_vmem [thread:$0]  %s564_s1, 256, %s29_s13, [#allocation6], %s458_s24, %s458_s24, %s459_s25  }
  0x14   :  { %s384_s30 = scalar_lea.hbm %s563_s0, 1024 }
  0x15   :  { %p385_p8 = scmp.ne.s32.totalorder %s563_s0, %s384_s30  ;;  %p388_p9 = scmp.lt.u32.totalorder %s384_s30, %s563_s0 }
  0x17   :  { %p390_p10 = pnand %p388_p9, %p385_p8 }
  0x19   :  { %393 = shalt.err (!%p390_p10)
}
  0x1a   :  { %s394_s8 = scalar_lea.vmem %s484_s15, 1024  ;;  %p399_p12 = scmp.lt.s32.totalorder %s484_s15, %s484_s15 }
  0x1b   :  { %p395_p11 = scmp.ne.s32.totalorder %s484_s15, %s394_s8  ;;  %p400_p13 = scmp.lt.s32.totalorder %s394_s8, %s394_s8 }
  0x1d   :  { %p401_p0 = por %p400_p13, %p399_p12 }
  0x1f   :  { %p402_p1 = pnand %p401_p0, %p395_p11 }
  0x21   :  { %405 = shalt.err (!%p402_p1)
}
  0x22   :  { %22 = dma.hbm_to_vmem [thread:$0]  %s563_s0, 1024, %s484_s15, [#allocation3], %s458_s24, %s458_s24, %s459_s25  }
  0x23   :  { %s460_s10 = smov [#allocation7]   ;;  %s406_s14 = scalar_lea.hbm %s565_s2, 16 }
  0x24   :  { %s41_s11 = sshll.u32 %s460_s10, 4  ;;  %p407_p2 = scmp.ne.s32.totalorder %s565_s2, %s406_s14  ;;  %s42_s11 = int_to_ptr.vmem [resolvable:$true] %s41_s11 }
  0x25   :  { %p410_p3 = scmp.lt.u32.totalorder %s406_s14, %s565_s2 }
  0x27   :  { %p412_p4 = pnand %p410_p3, %p407_p2 }
  0x29   :  { %415 = shalt.err (!%p412_p4)
}
  0x2a   :  { %s416_s20 = scalar_lea.vmem %s42_s11, 16  ;;  %s420_s0 = scalar_lea.vmem %s42_s11, 32 }
  0x2b   :  { %p417_p5 = scmp.ne.s32.totalorder %s42_s11, %s416_s20  ;;  %p421_p6 = scmp.lt.s32.totalorder %s42_s11, %s42_s11 }
  0x2c   :  { %p422_p7 = scmp.lt.s32.totalorder %s420_s0, %s416_s20 }
  0x2e   :  { %p423_p8 = por %p422_p7, %p421_p6 }
  0x30   :  { %p424_p9 = pnand %p423_p8, %p417_p5 }
  0x32   :  { %427 = shalt.err (!%p424_p9)
}
  0x33   :  { %44 = dma.hbm_to_vmem [thread:$0]  %s565_s2, 16, %s42_s11, [#allocation6]  }
  0x34   :  { %450 = dma.done.wait [#allocation3], 1024  }
  0x35   :  { %451 = vsyncadd [#allocation3], 4294966272 }
  0x36   :  { %452 = dma.done.wait [#allocation6], 272  }
  0x37   :  { %453 = vsyncadd [#allocation6], 4294967024  ;;  %v352_v0 = vld [vmem:[#allocation5] sm:$0xff]   ;;  %v353_v1 = vld [vmem:[#allocation5 + $0x8] sm:$0xff]   ;;  %vm134_vm0 = vcmask 261120   ;;  %vm256_vm1 = vcmask 523264  }
  0x38   :  { %320 = vmatprep.subr.bf16.mxu0 %v352_v0  ;;  %340 = vmatprep.subr.bf16.mxu1 %v352_v0  ;;  %v354_v2 = vld [vmem:[#allocation2] sm:$0xff]   ;;  %v356_v4 = vld [vmem:[#allocation2 + $0x8] sm:$0xff]   ;;  %v358_v6 = vld [vmem:[#allocation2 + $0x10] sm:$0xff]   ;;  %s461_s2 = smov [#allocation8]  }
  0x39   :  { %321 = vmatpush3.bf16.msra.mxu0 %v352_v0  ;;  %342 = vmatpush3.bf16.msra.mxu1 %v352_v0  ;;  %v355_v3 = vld [vmem:[#allocation2 + $0x20] sm:$0xff]   ;;  %v357_v5 = vld [vmem:[#allocation2 + $0x28] sm:$0xff]   ;;  %v359_v7 = vld [vmem:[#allocation2 + $0x30] sm:$0xff]   ;;  %s278_s22 = sshll.u32 %s461_s2, 4  ;;  %s279_s22 = int_to_ptr.vmem [resolvable:$true] %s278_s22 }
  0x3a   :  { %322 = vmatprep.subr.bf16.mxu0 %v353_v1  ;;  %341 = vmatprep.subr.bf16.mxu1 %v353_v1  ;;  %v360_v8 = vld [vmem:[#allocation2 + $0x18] sm:$0xff]   ;;  %v291_v10 = vld [vmem:[#allocation7] ss:$0 sm:$0xff]  ;;  %s428_s23 = scalar_lea.vmem %s279_s22, 2048  ;;  %p433_p11 = scmp.lt.s32.totalorder %s279_s22, %s279_s22 }
  0x3b   :  { %324 = vmatprep.mubr.msk.bf16.mxu0 %vm134_vm0, %v354_v2  ;;  %332 = vmatprep.mubr.msk.bf16.mxu1 %vm134_vm0, %v355_v3  ;;  %v361_v9 = vld [vmem:[#allocation2 + $0x38] sm:$0xff]   ;;  %p429_p10 = scmp.ne.s32.totalorder %s279_s22, %s428_s23  ;;  %p434_p12 = scmp.lt.s32.totalorder %s428_s23, %s428_s23 }
  0x3d   :  { %323 = vmatpush3.bf16.msra.mxu0 %v353_v1  ;;  %343 = vmatpush3.bf16.msra.mxu1 %v353_v1  ;;  %p435_p13 = por %p434_p12, %p433_p11 }
  0x3f   :  { %p436_p0 = pnand %p435_p13, %p429_p10 }
  0x40   :  { %325 = vmatmul.mubr.msk.bf16.vlgmr.msra.gmra.mrb[0].mxu0 %vm134_vm0, %v356_v4  ;;  %333 = vmatmul.mubr.msk.bf16.vlgmr.msra.gmra.mrb[0].mxu1 %vm134_vm0, %v357_v5 }
  0x41   :  { %328 = vmatprep.mubr.msk.bf16.mxu0 %vm134_vm0, %v358_v6  ;;  %336 = vmatprep.mubr.msk.bf16.mxu1 %vm134_vm0, %v359_v7 }
  0x48   :  { %329 = vmatmul.mubr.msk.bf16.gmra.mrb[4].mxu0 %vm134_vm0, %v360_v8  ;;  %337 = vmatmul.mubr.msk.bf16.gmra.mrb[4].mxu1 %vm134_vm0, %v361_v9 }
 0x113   :  { %v326_v11 = vpop.f32.mrb[0].mxu0  ;;  %v334_v12 = vpop.f32.mrb[0].mxu1 }
 0x114   :  { %v202_v13 = vadd.f32 %v326_v11, %v291_v10  ;;  %v234_v14 = vadd.f32 %v334_v12, %v291_v10  ;;  %v193_v15 = vpop.f32.mrb[1].mxu0  ;;  %v225_v16 = vpop.f32.mrb[1].mxu1 }
 0x115   :  { %v194_v17 = vadd.f32 %v291_v10, %v193_v15  ;;  %v226_v18 = vadd.f32 %v291_v10, %v225_v16  ;;  %v327_v19 = vpop.f32.mrb[2].mxu0  ;;  %v335_v20 = vpop.f32.mrb[2].mxu1 }
 0x116   :  { %259 = vst.msk [vmem:[#allocation8 + $0x10] sm:$0xff] %vm256_vm1, %v202_v13  ;;  %267 = vst.msk [vmem:[#allocation8 + $0x50] sm:$0xff] %vm256_vm1, %v234_v14  ;;  %v205_v21 = vadd.f32 %v327_v19, %v291_v10  ;;  %v237_v22 = vadd.f32 %v335_v20, %v291_v10  ;;  %v196_v23 = vpop.f32.mrb[3].mxu0  ;;  %v228_v24 = vpop.f32.mrb[3].mxu1 }
 0x117   :  { %257 = vst.msk [vmem:[#allocation8] sm:$0xff] %vm256_vm1, %v194_v17  ;;  %265 = vst.msk [vmem:[#allocation8 + $0x40] sm:$0xff] %vm256_vm1, %v226_v18  ;;  %v197_v25 = vadd.f32 %v291_v10, %v196_v23  ;;  %v229_v26 = vadd.f32 %v291_v10, %v228_v24 }
 0x118   :  { %260 = vst.msk [vmem:[#allocation8 + $0x18] sm:$0xff] %vm256_vm1, %v205_v21  ;;  %268 = vst.msk [vmem:[#allocation8 + $0x58] sm:$0xff] %vm256_vm1, %v237_v22 }
 0x119   :  { %258 = vst.msk [vmem:[#allocation8 + $0x8] sm:$0xff] %vm256_vm1, %v197_v25  ;;  %266 = vst.msk [vmem:[#allocation8 + $0x48] sm:$0xff] %vm256_vm1, %v229_v26 }
 0x11b   :  { %v330_v27 = vpop.f32.mrb[4].mxu0  ;;  %v338_v28 = vpop.f32.mrb[4].mxu1 }
 0x11c   :  { %v218_v29 = vadd.f32 %v330_v27, %v291_v10  ;;  %v250_v30 = vadd.f32 %v338_v28, %v291_v10  ;;  %v209_v31 = vpop.f32.mrb[5].mxu0  ;;  %v241_v32 = vpop.f32.mrb[5].mxu1 }
 0x11d   :  { %v210_v33 = vadd.f32 %v291_v10, %v209_v31  ;;  %v242_v34 = vadd.f32 %v291_v10, %v241_v32  ;;  %v331_v35 = vpop.f32.mrb[6].mxu0  ;;  %v339_v36 = vpop.f32.mrb[6].mxu1 }
 0x11e   :  { %263 = vst.msk [vmem:[#allocation8 + $0x30] sm:$0xff] %vm256_vm1, %v218_v29  ;;  %271 = vst.msk [vmem:[#allocation8 + $0x70] sm:$0xff] %vm256_vm1, %v250_v30  ;;  %v221_v37 = vadd.f32 %v331_v35, %v291_v10  ;;  %v253_v38 = vadd.f32 %v339_v36, %v291_v10  ;;  %v212_v39 = vpop.f32.mrb[7].mxu0  ;;  %v244_v40 = vpop.f32.mrb[7].mxu1 }
 0x11f   :  { %261 = vst.msk [vmem:[#allocation8 + $0x20] sm:$0xff] %vm256_vm1, %v210_v33  ;;  %269 = vst.msk [vmem:[#allocation8 + $0x60] sm:$0xff] %vm256_vm1, %v242_v34  ;;  %v213_v41 = vadd.f32 %v291_v10, %v212_v39  ;;  %v245_v42 = vadd.f32 %v291_v10, %v244_v40 }
 0x120   :  { %264 = vst.msk [vmem:[#allocation8 + $0x38] sm:$0xff] %vm256_vm1, %v221_v37  ;;  %272 = vst.msk [vmem:[#allocation8 + $0x78] sm:$0xff] %vm256_vm1, %v253_v38 }
 0x121   :  { %262 = vst.msk [vmem:[#allocation8 + $0x28] sm:$0xff] %vm256_vm1, %v213_v41  ;;  %270 = vst.msk [vmem:[#allocation8 + $0x68] sm:$0xff] %vm256_vm1, %v245_v42 }
 0x122   :  { %439 = shalt.err (!%p436_p0)
}
 0x123   :  { %s440_s26 = scalar_lea.hbm %s566_s3, 2048 }
 0x124   :  { %p441_p1 = scmp.ne.s32.totalorder %s566_s3, %s440_s26  ;;  %p444_p2 = scmp.lt.u32.totalorder %s440_s26, %s566_s3 }
 0x126   :  { %p446_p3 = pnand %p444_p2, %p441_p1 }
 0x128   :  { %449 = shalt.err (!%p446_p3)
}
 0x129   :  { %s462_s4 = smov 128   ;;  %s463_s5 = smov 8  }
 0x12a   :  { %284 = dma.vmem_to_hbm [thread:$0]  %s279_s22, 2048, %s566_s3, [#allocation4], %s462_s4, %s462_s4, %s463_s5  }
 0x12b   :  { %454 = dma.done.wait [#allocation4], 2048  }
 0x12c   :  { %455 = vsyncadd [#allocation4], 4294965248 }
 0x12d   :  { %288 = vsyncpa [#allocation3], 1 }
 0x12e   :  { %289 = vsyncpa [#allocation6], 1 }
 0x12f   :  { %290 = vsyncpa [#allocation4], 1 }

// kernel: extractor_forward.13
= control target key start
LH: loop header
LB: loop body
LE: loop exit
PB: predicated region body
PF: predicated region fallthrough
CT: control target
= control target key end

     0   :  { %8 = vsyncpa [#allocation3], 0  ;;  %s707_s0 = inlined_call_operand.hbm [shape: bf16[128,144], index: 0, kind: input, shape index: {}]   ;;  %s708_s1 = inlined_call_operand.hbm [shape: bf16[144,16], index: 1, kind: input, shape index: {}]   ;;  %s709_s2 = inlined_call_operand.hbm [shape: f32[1,16], index: 2, kind: input, shape index: {}]   ;;  %s710_s3 = inlined_call_operand.hbm [shape: f32[128,16], index: 3, kind: output, shape index: {}]  }
   0x1   :  { %9 = vsyncpa [#allocation6], 0 }
   0x2   :  { %10 = vsyncpa [#allocation4], 0  ;;  %s582_s12 = smov [#allocation5]   ;;  %s488_s16 = scalar_lea.hbm %s708_s1, 1152 }
   0x3   :  { %s28_s13 = sshll.u32 %s582_s12, 4  ;;  %p489_p0 = scmp.ne.s32.totalorder %s708_s1, %s488_s16  ;;  %s29_s13 = int_to_ptr.vmem [resolvable:$true] %s28_s13 }
   0x4   :  { %p492_p1 = scmp.lt.u32.totalorder %s488_s16, %s708_s1 }
   0x6   :  { %p494_p2 = pnand %p492_p1, %p489_p0 }
   0x8   :  { %497 = shalt.err (!%p494_p2)
}
   0x9   :  { %s498_s21 = scalar_lea.vmem %s29_s13, 1152  ;;  %p503_p4 = scmp.lt.s32.totalorder %s29_s13, %s29_s13 }
   0xa   :  { %p499_p3 = scmp.ne.s32.totalorder %s29_s13, %s498_s21  ;;  %p504_p5 = scmp.lt.s32.totalorder %s498_s21, %s498_s21 }
   0xc   :  { %p505_p6 = por %p504_p5, %p503_p4 }
   0xe   :  { %p506_p7 = pnand %p505_p6, %p499_p3 }
  0x10   :  { %509 = shalt.err (!%p506_p7)
}
  0x11   :  { %s583_s22 = smov 64   ;;  %s584_s23 = smov 4  }
  0x12   :  { %34 = dma.hbm_to_vmem [thread:$0]  %s708_s1, 1152, %s29_s13, [#allocation6], %s583_s22, %s583_s22, %s584_s23  }
  0x13   :  { %s585_s26 = smov [#allocation2]   ;;  %s510_s30 = scalar_lea.hbm %s707_s0, 2048 }
  0x14   :  { %s16_s27 = sshll.u32 %s585_s26, 4  ;;  %p511_p8 = scmp.ne.s32.totalorder %s707_s0, %s510_s30  ;;  %s17_s27 = int_to_ptr.vmem [resolvable:$true] %s16_s27 }
  0x15   :  { %p514_p9 = scmp.lt.u32.totalorder %s510_s30, %s707_s0 }
  0x17   :  { %p516_p10 = pnand %p514_p9, %p511_p8 }
  0x19   :  { %519 = shalt.err (!%p516_p10)
}
  0x1a   :  { %s520_s8 = scalar_lea.vmem %s17_s27, 2048  ;;  %p525_p12 = scmp.lt.s32.totalorder %s17_s27, %s17_s27 }
  0x1b   :  { %p521_p11 = scmp.ne.s32.totalorder %s17_s27, %s520_s8  ;;  %p526_p13 = scmp.lt.s32.totalorder %s520_s8, %s520_s8 }
  0x1d   :  { %p527_p0 = por %p526_p13, %p525_p12 }
  0x1f   :  { %p528_p1 = pnand %p527_p0, %p521_p11 }
  0x21   :  { %531 = shalt.err (!%p528_p1)
}
  0x22   :  { %s586_s1 = smov 128   ;;  %s587_s9 = smov 8  }
  0x23   :  { %22 = dma.hbm_to_vmem [thread:$0]  %s707_s0, 2048, %s17_s27, [#allocation3], %s586_s1, %s586_s1, %s587_s9  }
  0x24   :  { %s588_s12 = smov [#allocation7]   ;;  %s532_s16 = scalar_lea.hbm %s709_s2, 16 }
  0x25   :  { %s41_s13 = sshll.u32 %s588_s12, 4  ;;  %p533_p2 = scmp.ne.s32.totalorder %s709_s2, %s532_s16  ;;  %s42_s13 = int_to_ptr.vmem [resolvable:$true] %s41_s13 }
  0x26   :  { %p536_p3 = scmp.lt.u32.totalorder %s532_s16, %s709_s2 }
  0x28   :  { %p538_p4 = pnand %p536_p3, %p533_p2 }
  0x2a   :  { %541 = shalt.err (!%p538_p4)
}
  0x2b   :  { %s542_s21 = scalar_lea.vmem %s42_s13, 16  ;;  %s546_s0 = scalar_lea.vmem %s42_s13, 32 }
  0x2c   :  { %p543_p5 = scmp.ne.s32.totalorder %s42_s13, %s542_s21  ;;  %p547_p6 = scmp.lt.s32.totalorder %s42_s13, %s42_s13 }
  0x2d   :  { %p548_p7 = scmp.lt.s32.totalorder %s546_s0, %s542_s21 }
  0x2f   :  { %p549_p8 = por %p548_p7, %p547_p6 }
  0x31   :  { %p550_p9 = pnand %p549_p8, %p543_p5 }
  0x33   :  { %553 = shalt.err (!%p550_p9)
}
  0x34   :  { %44 = dma.hbm_to_vmem [thread:$0]  %s709_s2, 16, %s42_s13, [#allocation6]  }
  0x35   :  { %576 = dma.done.wait [#allocation3], 2048  }
  0x36   :  { %577 = vsyncadd [#allocation3], 4294965248 }
  0x37   :  { %578 = dma.done.wait [#allocation6], 1168  }
  0x38   :  { %579 = vsyncadd [#allocation6], 4294966128  ;;  %v589_v0 = vmov 0   ;;  %v455_v1 = vld [vmem:[#allocation5] sm:$0xff]   ;;  %v456_v2 = vld [vmem:[#allocation5 + $0x8] sm:$0xff]   ;;  %vm222_vm0 = vcmask 130048  }
  0x39   :  { %247 = vmatprep.subr.bf16.mxu0 %v589_v0  ;;  %428 = vmatprep.subr.bf16.mxu1 %v589_v0  ;;  %v457_v3 = vld [vmem:[#allocation5 + $0x10] sm:$0xff]   ;;  %v458_v4 = vld [vmem:[#allocation5 + $0x18] sm:$0xff]   ;;  %v466_v5 = vld [vmem:[#allocation2 + $0x4] ss:$8 sps:$4 sm:$0xff]   ;;  %s590_s2 = smov [#allocation8]  }
  0x3a   :  { %248 = vmatpush1.bf16.msra.mxu0 %v455_v1  ;;  %437 = vmatpush1.bf16.msra.mxu1 %v455_v1  ;;  %v469_v6 = vld [vmem:[#allocation2 + $0x44] ss:$8 sps:$4 sm:$0xff]   ;;  %v461_v9 = vld [vmem:[#allocation5 + $0x30] sm:$0xff]   ;;  %v462_v10 = vld [vmem:[#allocation5 + $0x38] sm:$0xff]   ;;  %s381_s24 = sshll.u32 %s590_s2, 4  ;;  %s382_s24 = int_to_ptr.vmem [resolvable:$true] %s381_s24 }
  0x3b   :  { %249 = vmatprep.subr.bf16.mxu0 %v589_v0  ;;  %429 = vmatprep.subr.bf16.mxu1 %v589_v0  ;;  %v459_v7 = vld [vmem:[#allocation5 + $0x20] sm:$0xff]   ;;  %v460_v8 = vld [vmem:[#allocation5 + $0x28] sm:$0xff]   ;;  %v470_v14 = vld [vmem:[#allocation2 + $0x14] ss:$8 sps:$4 sm:$0xff]   ;;  %s554_s25 = scalar_lea.vmem %s382_s24, 2048  ;;  %p559_p11 = scmp.lt.s32.totalorder %s382_s24, %s382_s24 }
  0x3c   :  { %420 = vmatprep.mubr.msk.bf16.mxu0 %vm222_vm0, %v466_v5  ;;  %424 = vmatprep.mubr.msk.bf16.mxu1 %vm222_vm0, %v469_v6  ;;  %v463_v11 = vld [vmem:[#allocation5 + $0x40] sm:$0xff]   ;;  %v472_v15 = vld [vmem:[#allocation2 + $0x54] ss:$8 sps:$4 sm:$0xff]   ;;  %v474_v16 = vld [vmem:[#allocation2 + $0x10] ss:$8 sps:$4 sm:$0xff]   ;;  %p555_p10 = scmp.ne.s32.totalorder %s382_s24, %s554_s25  ;;  %p560_p12 = scmp.lt.s32.totalorder %s554_s25, %s554_s25 }
  0x3d   :  { %v464_v12 = vld [vmem:[#allocation2] ss:$8 sps:$4 sm:$0xff]   ;;  %v475_v17 = vld [vmem:[#allocation2 + $0x50] ss:$8 sps:$4 sm:$0xff]   ;;  %v476_v18 = vld [vmem:[#allocation2 + $0x24] ss:$8 sps:$4 sm:$0xff]  }
  0x3e   :  { %250 = vmatpush1.bf16.msra.mxu0 %v456_v2  ;;  %438 = vmatpush1.bf16.msra.mxu1 %v456_v2  ;;  %v467_v13 = vld [vmem:[#allocation2 + $0x40] ss:$8 sps:$4 sm:$0xff]   ;;  %v478_v19 = vld [vmem:[#allocation2 + $0x64] ss:$8 sps:$4 sm:$0xff]   ;;  %v482_v22 = vld [vmem:[#allocation2 + $0x34] ss:$8 sps:$4 sm:$0xff]   ;;  %p561_p13 = por %p560_p12, %p559_p11 }
  0x3f   :  { %251 = vmatprep.subr.bf16.mxu0 %v589_v0  ;;  %430 = vmatprep.subr.bf16.mxu1 %v589_v0  ;;  %v480_v20 = vld [vmem:[#allocation2 + $0x20] ss:$8 sps:$4 sm:$0xff]   ;;  %v484_v23 = vld [vmem:[#allocation2 + $0x74] ss:$8 sps:$4 sm:$0xff]   ;;  %v486_v24 = vld [vmem:[#allocation2 + $0x30] ss:$8 sps:$4 sm:$0xff]  }
  0x40   :  { %v481_v21 = vld [vmem:[#allocation2 + $0x60] ss:$8 sps:$4 sm:$0xff]   ;;  %v487_v25 = vld [vmem:[#allocation2 + $0x70] ss:$8 sps:$4 sm:$0xff]   ;;  %p562_p0 = pnand %p561_p13, %p555_p10 }
  0x41   :  { %v658_v26 = vld [vmem:[#allocation7] ss:$0 sm:$0xff] }
  0x42   :  { %252 = vmatpush1.bf16.msra.mxu0 %v457_v3  ;;  %439 = vmatpush1.bf16.msra.mxu1 %v457_v3 }
  0x43   :  { %253 = vmatprep.subr.bf16.mxu0 %v589_v0  ;;  %431 = vmatprep.subr.bf16.mxu1 %v589_v0 }
  0x46   :  { %254 = vmatpush1.bf16.msra.mxu0 %v458_v4  ;;  %440 = vmatpush1.bf16.msra.mxu1 %v458_v4 }
  0x47   :  { %255 = vmatprep.subr.bf16.mxu0 %v589_v0  ;;  %432 = vmatprep.subr.bf16.mxu1 %v589_v0 }
  0x4a   :  { %256 = vmatpush1.bf16.msra.mxu0 %v459_v7  ;;  %441 = vmatpush1.bf16.msra.mxu1 %v459_v7 }
  0x4b   :  { %257 = vmatprep.subr.bf16.mxu0 %v589_v0  ;;  %433 = vmatprep.subr.bf16.mxu1 %v589_v0 }
  0x4e   :  { %258 = vmatpush1.bf16.msra.mxu0 %v460_v8  ;;  %442 = vmatpush1.bf16.msra.mxu1 %v460_v8 }
  0x4f   :  { %259 = vmatprep.subr.bf16.mxu0 %v589_v0  ;;  %434 = vmatprep.subr.bf16.mxu1 %v589_v0 }
  0x52   :  { %260 = vmatpush1.bf16.msra.mxu0 %v461_v9  ;;  %443 = vmatpush1.bf16.msra.mxu1 %v461_v9 }
  0x53   :  { %261 = vmatprep.subr.bf16.mxu0 %v589_v0  ;;  %435 = vmatprep.subr.bf16.mxu1 %v589_v0 }
  0x56   :  { %262 = vmatpush1.bf16.msra.mxu0 %v462_v10  ;;  %444 = vmatpush1.bf16.msra.mxu1 %v462_v10 }
  0x57   :  { %263 = vmatprep.subr.bf16.mxu0 %v589_v0  ;;  %436 = vmatprep.subr.bf16.mxu1 %v589_v0 }
  0x5a   :  { %264 = vmatpush1.bf16.msra.mxu0 %v463_v11  ;;  %445 = vmatpush1.bf16.msra.mxu1 %v463_v11 }
  0x5d   :  { %280 = vmatmul.mubr.bf16.vlgmr.msra.gmra.mrb[0].mxu0 %v464_v12  ;;  %312 = vmatmul.mubr.bf16.vlgmr.msra.gmra.mrb[0].mxu1 %v467_v13 }
  0x5e   :  { %421 = vmatprep.mubr.msk.bf16.mxu0 %vm222_vm0, %v470_v14  ;;  %425 = vmatprep.mubr.msk.bf16.mxu1 %vm222_vm0, %v472_v15 }
  0x65   :  { %288 = vmatmul.mubr.bf16.gmra.mrb[4].mxu0 %v474_v16  ;;  %320 = vmatmul.mubr.bf16.gmra.mrb[4].mxu1 %v475_v17 }
  0x66   :  { %422 = vmatprep.mubr.msk.bf16.mxu0 %vm222_vm0, %v476_v18  ;;  %426 = vmatprep.mubr.msk.bf16.mxu1 %vm222_vm0, %v478_v19 }
  0x6d   :  { %296 = vmatmul.mubr.bf16.gmra.mrb[8].mxu0 %v480_v20  ;;  %328 = vmatmul.mubr.bf16.gmra.mrb[8].mxu1 %v481_v21 }
  0x6e   :  { %423 = vmatprep.mubr.msk.bf16.mxu0 %vm222_vm0, %v482_v22  ;;  %427 = vmatprep.mubr.msk.bf16.mxu1 %vm222_vm0, %v484_v23 }
  0x75   :  { %304 = vmatmul.mubr.bf16.gmra.mrb[12].mxu0 %v486_v24  ;;  %336 = vmatmul.mubr.bf16.gmra.mrb[12].mxu1 %v487_v25 }
 0x130   :  { %v281_v27 = vpop.f32.mrb[0].mxu0  ;;  %v313_v28 = vpop.f32.mrb[0].mxu1 }
 0x131   :  { %v282_v29 = vadd.f32 %v658_v26, %v281_v27  ;;  %v314_v30 = vadd.f32 %v658_v26, %v313_v28  ;;  %v283_v31 = vpop.f32.mrb[1].mxu0  ;;  %v315_v32 = vpop.f32.mrb[1].mxu1 }
 0x132   :  { %v284_v33 = vpop.f32.mrb[2].mxu0  ;;  %v316_v34 = vpop.f32.mrb[2].mxu1 }
 0x133   :  { %v344_v35 = vmax.f32 %v282_v29, 0.0  ;;  %v352_v36 = vmax.f32 %v314_v30, 0.0  ;;  %v285_v37 = vadd.f32 %v658_v26, %v284_v33  ;;  %v317_v38 = vadd.f32 %v658_v26, %v316_v34  ;;  %v286_v39 = vpop.f32.mrb[3].mxu0  ;;  %v318_v40 = vpop.f32.mrb[3].mxu1 }
 0x135   :  { %360 = vst.msk [vmem:[#allocation8] sm:$0xff] %vm222_vm0, %v344_v35  ;;  %368 = vst.msk [vmem:[#allocation8 + $0x40] sm:$0xff] %vm222_vm0, %v352_v36  ;;  %v345_v41 = vmax.f32 %v285_v37, 0.0  ;;  %v353_v42 = vmax.f32 %v317_v38, 0.0 }
 0x137   :  { %361 = vst.msk [vmem:[#allocation8 + $0x8] sm:$0xff] %vm222_vm0, %v345_v41  ;;  %369 = vst.msk [vmem:[#allocation8 + $0x48] sm:$0xff] %vm222_vm0, %v353_v42 }
 0x138   :  { %v289_v43 = vpop.f32.mrb[4].mxu0  ;;  %v321_v44 = vpop.f32.mrb[4].mxu1 }
 0x139   :  { %v290_v45 = vadd.f32 %v658_v26, %v289_v43  ;;  %v322_v46 = vadd.f32 %v658_v26, %v321_v44  ;;  %v291_v47 = vpop.f32.mrb[5].mxu0  ;;  %v323_v48 = vpop.f32.mrb[5].mxu1 }
 0x13a   :  { %v292_v49 = vpop.f32.mrb[6].mxu0  ;;  %v324_v50 = vpop.f32.mrb[6].mxu1 }
 0x13b   :  { %v346_v51 = vmax.f32 %v290_v45, 0.0  ;;  %v354_v52 = vmax.f32 %v322_v46, 0.0  ;;  %v293_v53 = vadd.f32 %v658_v26, %v292_v49  ;;  %v325_v54 = vadd.f32 %v658_v26, %v324_v50  ;;  %v294_v55 = vpop.f32.mrb[7].mxu0  ;;  %v326_v56 = vpop.f32.mrb[7].mxu1 }
 0x13d   :  { %362 = vst.msk [vmem:[#allocation8 + $0x10] sm:$0xff] %vm222_vm0, %v346_v51  ;;  %370 = vst.msk [vmem:[#allocation8 + $0x50] sm:$0xff] %vm222_vm0, %v354_v52  ;;  %v347_v57 = vmax.f32 %v293_v53, 0.0  ;;  %v355_v58 = vmax.f32 %v325_v54, 0.0 }
 0x13f   :  { %363 = vst.msk [vmem:[#allocation8 + $0x18] sm:$0xff] %vm222_vm0, %v347_v57  ;;  %371 = vst.msk [vmem:[#allocation8 + $0x58] sm:$0xff] %vm222_vm0, %v355_v58 }
 0x140   :  { %v297_v59 = vpop.f32.mrb[8].mxu0  ;;  %v329_v60 = vpop.f32.mrb[8].mxu1 }
 0x141   :  { %v298_v61 = vadd.f32 %v658_v26, %v297_v59  ;;  %v330_v62 = vadd.f32 %v658_v26, %v329_v60  ;;  %v299_v63 = vpop.f32.mrb[9].mxu0  ;;  %v331_v0 = vpop.f32.mrb[9].mxu1 }
 0x142   :  { %v300_v1 = vpop.f32.mrb[10].mxu0  ;;  %v332_v2 = vpop.f32.mrb[10].mxu1 }
 0x143   :  { %v348_v3 = vmax.f32 %v298_v61, 0.0  ;;  %v356_v4 = vmax.f32 %v330_v62, 0.0  ;;  %v301_v5 = vadd.f32 %v658_v26, %v300_v1  ;;  %v333_v6 = vadd.f32 %v658_v26, %v332_v2  ;;  %v302_v7 = vpop.f32.mrb[11].mxu0  ;;  %v334_v8 = vpop.f32.mrb[11].mxu1 }
 0x145   :  { %364 = vst.msk [vmem:[#allocation8 + $0x20] sm:$0xff] %vm222_vm0, %v348_v3  ;;  %372 = vst.msk [vmem:[#allocation8 + $0x60] sm:$0xff] %vm222_vm0, %v356_v4  ;;  %v349_v9 = vmax.f32 %v301_v5, 0.0  ;;  %v357_v10 = vmax.f32 %v333_v6, 0.0 }
 0x147   :  { %365 = vst.msk [vmem:[#allocation8 + $0x28] sm:$0xff] %vm222_vm0, %v349_v9  ;;  %373 = vst.msk [vmem:[#allocation8 + $0x68] sm:$0xff] %vm222_vm0, %v357_v10 }
 0x148   :  { %v305_v11 = vpop.f32.mrb[12].mxu0  ;;  %v337_v12 = vpop.f32.mrb[12].mxu1 }
 0x149   :  { %v306_v13 = vadd.f32 %v658_v26, %v305_v11  ;;  %v338_v14 = vadd.f32 %v658_v26, %v337_v12  ;;  %v307_v15 = vpop.f32.mrb[13].mxu0  ;;  %v339_v16 = vpop.f32.mrb[13].mxu1 }
 0x14a   :  { %v308_v17 = vpop.f32.mrb[14].mxu0  ;;  %v340_v18 = vpop.f32.mrb[14].mxu1 }
 0x14b   :  { %v350_v19 = vmax.f32 %v306_v13, 0.0  ;;  %v358_v20 = vmax.f32 %v338_v14, 0.0  ;;  %v309_v21 = vadd.f32 %v658_v26, %v308_v17  ;;  %v341_v22 = vadd.f32 %v658_v26, %v340_v18  ;;  %v310_v23 = vpop.f32.mrb[15].mxu0  ;;  %v342_v24 = vpop.f32.mrb[15].mxu1 }
 0x14d   :  { %366 = vst.msk [vmem:[#allocation8 + $0x30] sm:$0xff] %vm222_vm0, %v350_v19  ;;  %374 = vst.msk [vmem:[#allocation8 + $0x70] sm:$0xff] %vm222_vm0, %v358_v20  ;;  %v351_v25 = vmax.f32 %v309_v21, 0.0  ;;  %v359_v27 = vmax.f32 %v341_v22, 0.0 }
 0x14f   :  { %367 = vst.msk [vmem:[#allocation8 + $0x38] sm:$0xff] %vm222_vm0, %v351_v25  ;;  %375 = vst.msk [vmem:[#allocation8 + $0x78] sm:$0xff] %vm222_vm0, %v359_v27 }
 0x150   :  { %565 = shalt.err (!%p562_p0)
}
 0x151   :  { %s566_s28 = scalar_lea.hbm %s710_s3, 2048 }
 0x152   :  { %p567_p1 = scmp.ne.s32.totalorder %s710_s3, %s566_s28  ;;  %p570_p2 = scmp.lt.u32.totalorder %s566_s28, %s710_s3 }
 0x154   :  { %p572_p3 = pnand %p570_p2, %p567_p1 }
 0x156   :  { %575 = shalt.err (!%p572_p3)
}
 0x157   :  { %387 = dma.vmem_to_hbm [thread:$0]  %s382_s24, 2048, %s710_s3, [#allocation4], %s586_s1, %s586_s1, %s587_s9  }
 0x158   :  { %580 = dma.done.wait [#allocation4], 2048  }
 0x159   :  { %581 = vsyncadd [#allocation4], 4294965248 }
 0x15a   :  { %391 = vsyncpa [#allocation3], 1 }
 0x15b   :  { %392 = vsyncpa [#allocation6], 1 }
 0x15c   :  { %393 = vsyncpa [#allocation4], 1 }

// kernel: extractor_forward.15
= control target key start
LH: loop header
LB: loop body
LE: loop exit
PB: predicated region body
PF: predicated region fallthrough
CT: control target
= control target key end

     0   :  { %9 = vsyncpa [#allocation3], 0  ;;  %s688_s0 = inlined_call_operand.hbm [shape: bf16[128,16], index: 0, kind: input, shape index: {}]   ;;  %s689_s1 = inlined_call_operand.hbm [shape: bf16[16,64], index: 1, kind: input, shape index: {}]   ;;  %s690_s2 = inlined_call_operand.hbm [shape: f32[1,64], index: 2, kind: input, shape index: {}]   ;;  %s691_s3 = inlined_call_operand.hbm [shape: f32[128,64], index: 3, kind: input, shape index: {}]   ;;  %s692_s4 = inlined_call_operand.hbm [shape: f32[128,64], index: 4, kind: output, shape index: {}]  }
   0x1   :  { %10 = vsyncpa [#allocation6], 0 }
   0x2   :  { %11 = vsyncpa [#allocation9], 0 }
   0x3   :  { %12 = vsyncpa [#allocation4], 0  ;;  %s532_s15 = smov [#allocation5]   ;;  %s533_s17 = smov [#allocation2]  }
   0x4   :  { %s30_s16 = sshll.u32 %s532_s15, 4  ;;  %s18_s18 = sshll.u32 %s533_s17, 4  ;;  %s31_s16 = int_to_ptr.vmem [resolvable:$true] %s30_s16  ;;  %s566_s18 = int_to_ptr.vmem [resolvable:$true] %s18_s18 }
   0x5   :  { %s414_s21 = scalar_lea.hbm %s689_s1, 128 }
   0x6   :  { %p415_p0 = scmp.ne.s32.totalorder %s689_s1, %s414_s21  ;;  %p418_p1 = scmp.lt.u32.totalorder %s414_s21, %s689_s1 }
   0x8   :  { %p420_p2 = pnand %p418_p1, %p415_p0 }
   0xa   :  { %423 = shalt.err (!%p420_p2)
}
   0xb   :  { %s424_s26 = scalar_lea.vmem %s31_s16, 128  ;;  %p429_p4 = scmp.lt.s32.totalorder %s31_s16, %s31_s16 }
   0xc   :  { %p425_p3 = scmp.ne.s32.totalorder %s31_s16, %s424_s26  ;;  %p430_p5 = scmp.lt.s32.totalorder %s424_s26, %s424_s26 }
   0xe   :  { %p431_p6 = por %p430_p5, %p429_p4 }
  0x10   :  { %p432_p7 = pnand %p431_p6, %p425_p3 }
  0x12   :  { %435 = shalt.err (!%p432_p7)
}
  0x13   :  { %s534_s27 = smov 64   ;;  %s535_s28 = smov 4  }
  0x14   :  { %36 = dma.hbm_to_vmem [thread:$0]  %s689_s1, 128, %s31_s16, [#allocation6], %s534_s27, %s534_s27, %s535_s28  }
  0x15   :  { %s436_s7 = scalar_lea.hbm %s688_s0, 1024 }
  0x16   :  { %p437_p8 = scmp.ne.s32.totalorder %s688_s0, %s436_s7  ;;  %p440_p9 = scmp.lt.u32.totalorder %s436_s7, %s688_s0 }
  0x18   :  { %p442_p10 = pnand %p440_p9, %p437_p8 }
  0x1a   :  { %445 = shalt.err (!%p442_p10)
}
  0x1b   :  { %s446_s12 = scalar_lea.vmem %s566_s18, 1024  ;;  %p451_p12 = scmp.lt.s32.totalorder %s566_s18, %s566_s18 }
  0x1c   :  { %p447_p11 = scmp.ne.s32.totalorder %s566_s18, %s446_s12  ;;  %p452_p13 = scmp.lt.s32.totalorder %s446_s12, %s446_s12 }
  0x1e   :  { %p453_p0 = por %p452_p13, %p451_p12 }
  0x20   :  { %p454_p1 = pnand %p453_p0, %p447_p11 }
  0x22   :  { %457 = shalt.err (!%p454_p1)
}
  0x23   :  { %24 = dma.hbm_to_vmem [thread:$0]  %s688_s0, 1024, %s566_s18, [#allocation3], %s534_s27, %s534_s27, %s535_s28  }
  0x24   :  { %s536_s14 = smov [#allocation7]   ;;  %s537_s16 = smov [#allocation8]  }
  0x25   :  { %s43_s15 = sshll.u32 %s536_s14, 4  ;;  %s52_s17 = sshll.u32 %s537_s16, 4  ;;  %s44_s15 = int_to_ptr.vmem [resolvable:$true] %s43_s15  ;;  %s597_s17 = int_to_ptr.vmem [resolvable:$true] %s52_s17 }
  0x26   :  { %s458_s21 = scalar_lea.hbm %s690_s2, 16 }
  0x27   :  { %p459_p2 = scmp.ne.s32.totalorder %s690_s2, %s458_s21  ;;  %p462_p3 = scmp.lt.u32.totalorder %s458_s21, %s690_s2 }
  0x29   :  { %p464_p4 = pnand %p462_p3, %p459_p2 }
  0x2b   :  { %467 = shalt.err (!%p464_p4)
}
  0x2c   :  { %s468_s0 = scalar_lea.vmem %s44_s15, 16  ;;  %s472_s18 = scalar_lea.vmem %s44_s15, 32 }
  0x2d   :  { %p469_p5 = scmp.ne.s32.totalorder %s44_s15, %s468_s0  ;;  %p473_p6 = scmp.lt.s32.totalorder %s44_s15, %s44_s15 }
  0x2e   :  { %p474_p7 = scmp.lt.s32.totalorder %s472_s18, %s468_s0 }
  0x30   :  { %p475_p8 = por %p474_p7, %p473_p6 }
  0x32   :  { %p476_p9 = pnand %p475_p8, %p469_p5 }
  0x34   :  { %479 = shalt.err (!%p476_p9)
}
  0x35   :  { %46 = dma.hbm_to_vmem [thread:$0]  %s690_s2, 16, %s44_s15, [#allocation6]  }
  0x36   :  { %s480_s30 = scalar_lea.hbm %s691_s3, 2048 }
  0x37   :  { %p481_p10 = scmp.ne.s32.totalorder %s691_s3, %s480_s30  ;;  %p484_p11 = scmp.lt.u32.totalorder %s480_s30, %s691_s3 }
  0x39   :  { %p486_p12 = pnand %p484_p11, %p481_p10 }
  0x3b   :  { %489 = shalt.err (!%p486_p12)
}
  0x3c   :  { %s490_s9 = scalar_lea.vmem %s597_s17, 2048  ;;  %p495_p0 = scmp.lt.s32.totalorder %s597_s17, %s597_s17 }
  0x3d   :  { %p491_p13 = scmp.ne.s32.totalorder %s597_s17, %s490_s9  ;;  %p496_p1 = scmp.lt.s32.totalorder %s490_s9, %s490_s9 }
  0x3f   :  { %p497_p2 = por %p496_p1, %p495_p0 }
  0x41   :  { %p498_p3 = pnand %p497_p2, %p491_p13 }
  0x43   :  { %501 = shalt.err (!%p498_p3)
}
  0x44   :  { %s538_s2 = smov 128   ;;  %s539_s10 = smov 8  }
  0x45   :  { %58 = dma.hbm_to_vmem [thread:$0]  %s691_s3, 2048, %s597_s17, [#allocation9], %s538_s2, %s538_s2, %s539_s10  }
  0x46   :  { %524 = dma.done.wait [#allocation3], 1024  }
  0x47   :  { %525 = vsyncadd [#allocation3], 4294966272 }
  0x48   :  { %526 = dma.done.wait [#allocation6], 144  }
  0x49   :  { %527 = vsyncadd [#allocation6], 4294967152 }
  0x4a   :  { %528 = dma.done.wait [#allocation9], 2048  }
  0x4b   :  { %529 = vsyncadd [#allocation9], 4294965248  ;;  %v405_v0 = vld [vmem:[#allocation5] sm:$0xff]   ;;  %vm143_vm0 = vcmask 130048   ;;  %v408_v3 = vld [vmem:[#allocation2 + $0x8] sm:$0xff]   ;;  %vm313_vm1 = vcmask 523264  }
  0x4c   :  { %v406_v1 = vld [vmem:[#allocation2] sm:$0xff]   ;;  %376 = vmatprep.subr.bf16.mxu0 %v405_v0  ;;  %394 = vmatprep.subr.bf16.mxu1 %v405_v0  ;;  %v409_v4 = vld [vmem:[#allocation2 + $0x28] sm:$0xff]   ;;  %v410_v5 = vld [vmem:[#allocation2 + $0x10] sm:$0xff]   ;;  %s540_s3 = smov [#allocation10]  }
  0x4d   :  { %v407_v2 = vld [vmem:[#allocation2 + $0x20] sm:$0xff]   ;;  %377 = vmatpush3.bf16.msra.mxu0 %v405_v0  ;;  %395 = vmatpush3.bf16.msra.mxu1 %v405_v0  ;;  %v411_v6 = vld [vmem:[#allocation2 + $0x30] sm:$0xff]   ;;  %v412_v7 = vld [vmem:[#allocation2 + $0x18] sm:$0xff]   ;;  %s335_s1 = sshll.u32 %s540_s3, 4  ;;  %s336_s1 = int_to_ptr.vmem [resolvable:$true] %s335_s1 }
  0x4e   :  { %378 = vmatprep.mubr.msk.bf16.mxu0 %vm143_vm0, %v406_v1  ;;  %386 = vmatprep.mubr.msk.bf16.mxu1 %vm143_vm0, %v407_v2  ;;  %v413_v8 = vld [vmem:[#allocation2 + $0x38] sm:$0xff]   ;;  %v639_v9 = vld [vmem:[#allocation7] ss:$0 sm:$0xff]  ;;  %v265_v17 = vld [vmem:[#allocation8] sm:$0xff]  ;;  %s502_s13 = scalar_lea.vmem %s336_s1, 2048  ;;  %p507_p5 = scmp.lt.s32.totalorder %s336_s1, %s336_s1 }
  0x4f   :  { %v267_v11 = vld [vmem:[#allocation8 + $0x10] sm:$0xff]  ;;  %v273_v19 = vld [vmem:[#allocation8 + $0x40] sm:$0xff]  ;;  %v268_v23 = vld [vmem:[#allocation8 + $0x18] sm:$0xff]  ;;  %p503_p4 = scmp.ne.s32.totalorder %s336_s1, %s502_s13  ;;  %p508_p6 = scmp.lt.s32.totalorder %s502_s13, %s502_s13 }
  0x50   :  { %379 = vmatmul.mubr.msk.bf16.vlgmr.msra.gmra.mrb[0].mxu0 %vm143_vm0, %v408_v3  ;;  %387 = vmatmul.mubr.msk.bf16.vlgmr.msra.gmra.mrb[0].mxu1 %vm143_vm0, %v409_v4  ;;  %v275_v13 = vld [vmem:[#allocation8 + $0x50] sm:$0xff]  ;;  %v276_v25 = vld [vmem:[#allocation8 + $0x58] sm:$0xff]  ;;  %v266_v31 = vld [vmem:[#allocation8 + $0x8] sm:$0xff] }
  0x51   :  { %382 = vmatprep.mubr.msk.bf16.mxu0 %vm143_vm0, %v410_v5  ;;  %390 = vmatprep.mubr.msk.bf16.mxu1 %vm143_vm0, %v411_v6  ;;  %v274_v33 = vld [vmem:[#allocation8 + $0x48] sm:$0xff]  ;;  %v271_v51 = vld [vmem:[#allocation8 + $0x30] sm:$0xff]  ;;  %v269_v57 = vld [vmem:[#allocation8 + $0x20] sm:$0xff]  ;;  %p509_p7 = por %p508_p6, %p507_p5 }
  0x52   :  { %v279_v53 = vld [vmem:[#allocation8 + $0x70] sm:$0xff]  ;;  %v277_v59 = vld [vmem:[#allocation8 + $0x60] sm:$0xff]  ;;  %v272_v63 = vld [vmem:[#allocation8 + $0x38] sm:$0xff] }
  0x53   :  { %v280_v1 = vld [vmem:[#allocation8 + $0x78] sm:$0xff]  ;;  %p510_p8 = pnand %p509_p7, %p503_p4 }
  0x58   :  { %383 = vmatmul.mubr.msk.bf16.gmra.mrb[4].mxu0 %vm143_vm0, %v412_v7  ;;  %391 = vmatmul.mubr.msk.bf16.gmra.mrb[4].mxu1 %vm143_vm0, %v413_v8  ;;  %v270_v7 = vld [vmem:[#allocation8 + $0x28] sm:$0xff] }
 0x123   :  { %v380_v10 = vpop.f32.mrb[0].mxu0  ;;  %v388_v12 = vpop.f32.mrb[0].mxu1 }
 0x124   :  { %v211_v14 = vadd.f32 %v380_v10, %v639_v9  ;;  %v243_v15 = vadd.f32 %v388_v12, %v639_v9  ;;  %v202_v16 = vpop.f32.mrb[1].mxu0  ;;  %v234_v18 = vpop.f32.mrb[1].mxu1  ;;  %v278_v10 = vld [vmem:[#allocation8 + $0x68] sm:$0xff] }
 0x125   :  { %v203_v20 = vadd.f32 %v639_v9, %v202_v16  ;;  %v235_v21 = vadd.f32 %v639_v9, %v234_v18  ;;  %v381_v22 = vpop.f32.mrb[2].mxu0  ;;  %v389_v24 = vpop.f32.mrb[2].mxu1 }
 0x126   :  { %v283_v26 = vadd.f32 %v267_v11, %v211_v14  ;;  %v291_v27 = vadd.f32 %v275_v13, %v243_v15  ;;  %v214_v28 = vadd.f32 %v381_v22, %v639_v9  ;;  %v246_v29 = vadd.f32 %v389_v24, %v639_v9  ;;  %v205_v30 = vpop.f32.mrb[3].mxu0  ;;  %v237_v32 = vpop.f32.mrb[3].mxu1 }
 0x127   :  { %v281_v34 = vadd.f32 %v265_v17, %v203_v20  ;;  %v289_v35 = vadd.f32 %v273_v19, %v235_v21  ;;  %v206_v36 = vadd.f32 %v639_v9, %v205_v30  ;;  %v238_v37 = vadd.f32 %v639_v9, %v237_v32 }
 0x128   :  { %v299_v38 = vmax.f32 %v283_v26, 0.0  ;;  %v307_v39 = vmax.f32 %v291_v27, 0.0  ;;  %v284_v40 = vadd.f32 %v268_v23, %v214_v28  ;;  %v292_v41 = vadd.f32 %v276_v25, %v246_v29 }
 0x129   :  { %v297_v42 = vmax.f32 %v281_v34, 0.0  ;;  %v305_v43 = vmax.f32 %v289_v35, 0.0  ;;  %v282_v44 = vadd.f32 %v266_v31, %v206_v36  ;;  %v290_v45 = vadd.f32 %v274_v33, %v238_v37 }
 0x12a   :  { %316 = vst.msk [vmem:[#allocation10 + $0x10] sm:$0xff] %vm313_vm1, %v299_v38  ;;  %324 = vst.msk [vmem:[#allocation10 + $0x50] sm:$0xff] %vm313_vm1, %v307_v39  ;;  %v300_v46 = vmax.f32 %v284_v40, 0.0  ;;  %v308_v47 = vmax.f32 %v292_v41, 0.0 }
 0x12b   :  { %314 = vst.msk [vmem:[#allocation10] sm:$0xff] %vm313_vm1, %v297_v42  ;;  %322 = vst.msk [vmem:[#allocation10 + $0x40] sm:$0xff] %vm313_vm1, %v305_v43  ;;  %v298_v48 = vmax.f32 %v282_v44, 0.0  ;;  %v306_v49 = vmax.f32 %v290_v45, 0.0  ;;  %v384_v50 = vpop.f32.mrb[4].mxu0  ;;  %v392_v52 = vpop.f32.mrb[4].mxu1 }
 0x12c   :  { %317 = vst.msk [vmem:[#allocation10 + $0x18] sm:$0xff] %vm313_vm1, %v300_v46  ;;  %325 = vst.msk [vmem:[#allocation10 + $0x58] sm:$0xff] %vm313_vm1, %v308_v47  ;;  %v227_v54 = vadd.f32 %v384_v50, %v639_v9  ;;  %v259_v55 = vadd.f32 %v392_v52, %v639_v9  ;;  %v218_v56 = vpop.f32.mrb[5].mxu0  ;;  %v250_v58 = vpop.f32.mrb[5].mxu1 }
 0x12d   :  { %315 = vst.msk [vmem:[#allocation10 + $0x8] sm:$0xff] %vm313_vm1, %v298_v48  ;;  %323 = vst.msk [vmem:[#allocation10 + $0x48] sm:$0xff] %vm313_vm1, %v306_v49  ;;  %v219_v60 = vadd.f32 %v639_v9, %v218_v56  ;;  %v251_v61 = vadd.f32 %v639_v9, %v250_v58  ;;  %v385_v62 = vpop.f32.mrb[6].mxu0  ;;  %v393_v0 = vpop.f32.mrb[6].mxu1 }
 0x12e   :  { %v287_v2 = vadd.f32 %v271_v51, %v227_v54  ;;  %v295_v3 = vadd.f32 %v279_v53, %v259_v55  ;;  %v230_v4 = vadd.f32 %v385_v62, %v639_v9  ;;  %v262_v5 = vadd.f32 %v393_v0, %v639_v9  ;;  %v221_v6 = vpop.f32.mrb[7].mxu0  ;;  %v253_v8 = vpop.f32.mrb[7].mxu1 }
 0x12f   :  { %v285_v11 = vadd.f32 %v269_v57, %v219_v60  ;;  %v293_v12 = vadd.f32 %v277_v59, %v251_v61  ;;  %v222_v13 = vadd.f32 %v639_v9, %v221_v6  ;;  %v254_v14 = vadd.f32 %v639_v9, %v253_v8 }
 0x130   :  { %v303_v15 = vmax.f32 %v287_v2, 0.0  ;;  %v311_v16 = vmax.f32 %v295_v3, 0.0  ;;  %v288_v17 = vadd.f32 %v272_v63, %v230_v4  ;;  %v296_v18 = vadd.f32 %v280_v1, %v262_v5 }
 0x131   :  { %v301_v19 = vmax.f32 %v285_v11, 0.0  ;;  %v309_v20 = vmax.f32 %v293_v12, 0.0  ;;  %v286_v21 = vadd.f32 %v270_v7, %v222_v13  ;;  %v294_v22 = vadd.f32 %v278_v10, %v254_v14 }
 0x132   :  { %320 = vst.msk [vmem:[#allocation10 + $0x30] sm:$0xff] %vm313_vm1, %v303_v15  ;;  %328 = vst.msk [vmem:[#allocation10 + $0x70] sm:$0xff] %vm313_vm1, %v311_v16  ;;  %v304_v23 = vmax.f32 %v288_v17, 0.0  ;;  %v312_v24 = vmax.f32 %v296_v18, 0.0 }
 0x133   :  { %318 = vst.msk [vmem:[#allocation10 + $0x20] sm:$0xff] %vm313_vm1, %v301_v19  ;;  %326 = vst.msk [vmem:[#allocation10 + $0x60] sm:$0xff] %vm313_vm1, %v309_v20  ;;  %v302_v9 = vmax.f32 %v286_v21, 0.0  ;;  %v310_v25 = vmax.f32 %v294_v22, 0.0 }
 0x134   :  { %321 = vst.msk [vmem:[#allocation10 + $0x38] sm:$0xff] %vm313_vm1, %v304_v23  ;;  %329 = vst.msk [vmem:[#allocation10 + $0x78] sm:$0xff] %vm313_vm1, %v312_v24 }
 0x135   :  { %319 = vst.msk [vmem:[#allocation10 + $0x28] sm:$0xff] %vm313_vm1, %v302_v9  ;;  %327 = vst.msk [vmem:[#allocation10 + $0x68] sm:$0xff] %vm313_vm1, %v310_v25 }
 0x136   :  { %513 = shalt.err (!%p510_p8)
}
 0x137   :  { %s514_s16 = scalar_lea.hbm %s692_s4, 2048 }
 0x138   :  { %p515_p9 = scmp.ne.s32.totalorder %s692_s4, %s514_s16  ;;  %p518_p10 = scmp.lt.u32.totalorder %s514_s16, %s692_s4 }
 0x13a   :  { %p520_p11 = pnand %p518_p10, %p515_p9 }
 0x13c   :  { %523 = shalt.err (!%p520_p11)
}
 0x13d   :  { %341 = dma.vmem_to_hbm [thread:$0]  %s336_s1, 2048, %s692_s4, [#allocation4], %s538_s2, %s538_s2, %s539_s10  }
 0x13e   :  { %530 = dma.done.wait [#allocation4], 2048  }
 0x13f   :  { %531 = vsyncadd [#allocation4], 4294965248 }
 0x140   :  { %345 = vsyncpa [#allocation3], 1 }
 0x141   :  { %346 = vsyncpa [#allocation6], 1 }
 0x142   :  { %347 = vsyncpa [#allocation9], 1 }
 0x143   :  { %348 = vsyncpa [#allocation4], 1 }

// kernel: extractor_forward.16
= control target key start
LH: loop header
LB: loop body
LE: loop exit
PB: predicated region body
PF: predicated region fallthrough
CT: control target
= control target key end

     0   :  { %8 = vsyncpa [#allocation3], 0  ;;  %s609_s0 = inlined_call_operand.hbm [shape: bf16[128,64], index: 0, kind: input, shape index: {}]   ;;  %s610_s1 = inlined_call_operand.hbm [shape: bf16[64,16], index: 1, kind: input, shape index: {}]   ;;  %s611_s2 = inlined_call_operand.hbm [shape: f32[1,16], index: 2, kind: input, shape index: {}]   ;;  %s612_s3 = inlined_call_operand.hbm [shape: f32[128,16], index: 3, kind: output, shape index: {}]  }
   0x1   :  { %9 = vsyncpa [#allocation6], 0 }
   0x2   :  { %10 = vsyncpa [#allocation4], 0  ;;  %s502_s12 = smov [#allocation5]   ;;  %s503_s14 = smov [#allocation2]  }
   0x3   :  { %s28_s13 = sshll.u32 %s502_s12, 4  ;;  %s16_s15 = sshll.u32 %s503_s14, 4  ;;  %s29_s13 = int_to_ptr.vmem [resolvable:$true] %s28_s13  ;;  %s530_s15 = int_to_ptr.vmem [resolvable:$true] %s16_s15 }
   0x4   :  { %s408_s18 = scalar_lea.hbm %s610_s1, 512 }
   0x5   :  { %p409_p0 = scmp.ne.s32.totalorder %s610_s1, %s408_s18  ;;  %p412_p1 = scmp.lt.u32.totalorder %s408_s18, %s610_s1 }
   0x7   :  { %p414_p2 = pnand %p412_p1, %p409_p0 }
   0x9   :  { %417 = shalt.err (!%p414_p2)
}
   0xa   :  { %s418_s23 = scalar_lea.vmem %s29_s13, 512  ;;  %p423_p4 = scmp.lt.s32.totalorder %s29_s13, %s29_s13 }
   0xb   :  { %p419_p3 = scmp.ne.s32.totalorder %s29_s13, %s418_s23  ;;  %p424_p5 = scmp.lt.s32.totalorder %s418_s23, %s418_s23 }
   0xd   :  { %p425_p6 = por %p424_p5, %p423_p4 }
   0xf   :  { %p426_p7 = pnand %p425_p6, %p419_p3 }
  0x11   :  { %429 = shalt.err (!%p426_p7)
}
  0x12   :  { %s504_s24 = smov 64   ;;  %s505_s25 = smov 4  }
  0x13   :  { %34 = dma.hbm_to_vmem [thread:$0]  %s610_s1, 512, %s29_s13, [#allocation6], %s504_s24, %s504_s24, %s505_s25  }
  0x14   :  { %s430_s30 = scalar_lea.hbm %s609_s0, 1024 }
  0x15   :  { %p431_p8 = scmp.ne.s32.totalorder %s609_s0, %s430_s30  ;;  %p434_p9 = scmp.lt.u32.totalorder %s430_s30, %s609_s0 }
  0x17   :  { %p436_p10 = pnand %p434_p9, %p431_p8 }
  0x19   :  { %439 = shalt.err (!%p436_p10)
}
  0x1a   :  { %s440_s8 = scalar_lea.vmem %s530_s15, 1024  ;;  %p445_p12 = scmp.lt.s32.totalorder %s530_s15, %s530_s15 }
  0x1b   :  { %p441_p11 = scmp.ne.s32.totalorder %s530_s15, %s440_s8  ;;  %p446_p13 = scmp.lt.s32.totalorder %s440_s8, %s440_s8 }
  0x1d   :  { %p447_p0 = por %p446_p13, %p445_p12 }
  0x1f   :  { %p448_p1 = pnand %p447_p0, %p441_p11 }
  0x21   :  { %451 = shalt.err (!%p448_p1)
}
  0x22   :  { %22 = dma.hbm_to_vmem [thread:$0]  %s609_s0, 1024, %s530_s15, [#allocation3], %s504_s24, %s504_s24, %s505_s25  }
  0x23   :  { %s506_s10 = smov [#allocation7]   ;;  %s452_s14 = scalar_lea.hbm %s611_s2, 16 }
  0x24   :  { %s41_s11 = sshll.u32 %s506_s10, 4  ;;  %p453_p2 = scmp.ne.s32.totalorder %s611_s2, %s452_s14  ;;  %s42_s11 = int_to_ptr.vmem [resolvable:$true] %s41_s11 }
  0x25   :  { %p456_p3 = scmp.lt.u32.totalorder %s452_s14, %s611_s2 }
  0x27   :  { %p458_p4 = pnand %p456_p3, %p453_p2 }
  0x29   :  { %461 = shalt.err (!%p458_p4)
}
  0x2a   :  { %s462_s20 = scalar_lea.vmem %s42_s11, 16  ;;  %s466_s0 = scalar_lea.vmem %s42_s11, 32 }
  0x2b   :  { %p463_p5 = scmp.ne.s32.totalorder %s42_s11, %s462_s20  ;;  %p467_p6 = scmp.lt.s32.totalorder %s42_s11, %s42_s11 }
  0x2c   :  { %p468_p7 = scmp.lt.s32.totalorder %s466_s0, %s462_s20 }
  0x2e   :  { %p469_p8 = por %p468_p7, %p467_p6 }
  0x30   :  { %p470_p9 = pnand %p469_p8, %p463_p5 }
  0x32   :  { %473 = shalt.err (!%p470_p9)
}
  0x33   :  { %44 = dma.hbm_to_vmem [thread:$0]  %s611_s2, 16, %s42_s11, [#allocation6]  }
  0x34   :  { %496 = dma.done.wait [#allocation3], 1024  }
  0x35   :  { %497 = vsyncadd [#allocation3], 4294966272 }
  0x36   :  { %498 = dma.done.wait [#allocation6], 528  }
  0x37   :  { %499 = vsyncadd [#allocation6], 4294966768  ;;  %v396_v0 = vld [vmem:[#allocation5] sm:$0xff]   ;;  %v397_v1 = vld [vmem:[#allocation5 + $0x8] sm:$0xff]   ;;  %vm150_vm0 = vcmask 523264   ;;  %vm288_vm1 = vcmask 130048  }
  0x38   :  { %356 = vmatprep.subr.bf16.mxu0 %v396_v0  ;;  %380 = vmatprep.subr.bf16.mxu1 %v396_v0  ;;  %v398_v2 = vld [vmem:[#allocation5 + $0x10] sm:$0xff]   ;;  %v400_v3 = vld [vmem:[#allocation2] sm:$0xff]   ;;  %v399_v5 = vld [vmem:[#allocation5 + $0x18] sm:$0xff]   ;;  %s507_s2 = smov [#allocation8]  }
  0x39   :  { %357 = vmatpush3.bf16.msra.mxu0 %v396_v0  ;;  %384 = vmatpush3.bf16.msra.mxu1 %v396_v0  ;;  %v401_v4 = vld [vmem:[#allocation2 + $0x20] sm:$0xff]   ;;  %v402_v6 = vld [vmem:[#allocation2 + $0x8] sm:$0xff]   ;;  %v404_v8 = vld [vmem:[#allocation2 + $0x10] sm:$0xff]   ;;  %s310_s22 = sshll.u32 %s507_s2, 4  ;;  %s311_s22 = int_to_ptr.vmem [resolvable:$true] %s310_s22 }
  0x3a   :  { %358 = vmatprep.subr.bf16.mxu0 %v397_v1  ;;  %381 = vmatprep.subr.bf16.mxu1 %v397_v1  ;;  %v403_v7 = vld [vmem:[#allocation2 + $0x28] sm:$0xff]   ;;  %v405_v9 = vld [vmem:[#allocation2 + $0x30] sm:$0xff]   ;;  %v406_v10 = vld [vmem:[#allocation2 + $0x18] sm:$0xff]   ;;  %s474_s23 = scalar_lea.vmem %s311_s22, 2048  ;;  %p479_p11 = scmp.lt.s32.totalorder %s311_s22, %s311_s22 }
  0x3b   :  { %364 = vmatprep.mubr.msk.bf16.mxu0 %vm150_vm0, %v400_v3  ;;  %372 = vmatprep.mubr.msk.bf16.mxu1 %vm150_vm0, %v401_v4  ;;  %v407_v11 = vld [vmem:[#allocation2 + $0x38] sm:$0xff]   ;;  %v323_v12 = vld [vmem:[#allocation7] ss:$0 sm:$0xff]  ;;  %p475_p10 = scmp.ne.s32.totalorder %s311_s22, %s474_s23  ;;  %p480_p12 = scmp.lt.s32.totalorder %s474_s23, %s474_s23 }
  0x3d   :  { %359 = vmatpush3.bf16.msra.mxu0 %v397_v1  ;;  %385 = vmatpush3.bf16.msra.mxu1 %v397_v1  ;;  %p481_p13 = por %p480_p12, %p479_p11 }
  0x3e   :  { %360 = vmatprep.subr.bf16.mxu0 %v398_v2  ;;  %382 = vmatprep.subr.bf16.mxu1 %v398_v2 }
  0x3f   :  { %p482_p0 = pnand %p481_p13, %p475_p10 }
  0x41   :  { %361 = vmatpush3.bf16.msra.mxu0 %v398_v2  ;;  %386 = vmatpush3.bf16.msra.mxu1 %v398_v2 }
  0x42   :  { %362 = vmatprep.subr.bf16.mxu0 %v399_v5  ;;  %383 = vmatprep.subr.bf16.mxu1 %v399_v5 }
  0x45   :  { %363 = vmatpush3.bf16.msra.mxu0 %v399_v5  ;;  %387 = vmatpush3.bf16.msra.mxu1 %v399_v5 }
  0x48   :  { %365 = vmatmul.mubr.msk.bf16.vlgmr.msra.gmra.mrb[0].mxu0 %vm150_vm0, %v402_v6  ;;  %373 = vmatmul.mubr.msk.bf16.vlgmr.msra.gmra.mrb[0].mxu1 %vm150_vm0, %v403_v7 }
  0x49   :  { %368 = vmatprep.mubr.msk.bf16.mxu0 %vm150_vm0, %v404_v8  ;;  %376 = vmatprep.mubr.msk.bf16.mxu1 %vm150_vm0, %v405_v9 }
  0x50   :  { %369 = vmatmul.mubr.msk.bf16.gmra.mrb[4].mxu0 %vm150_vm0, %v406_v10  ;;  %377 = vmatmul.mubr.msk.bf16.gmra.mrb[4].mxu1 %vm150_vm0, %v407_v11 }
 0x11b   :  { %v366_v13 = vpop.f32.mrb[0].mxu0  ;;  %v374_v14 = vpop.f32.mrb[0].mxu1 }
 0x11c   :  { %v218_v15 = vadd.f32 %v366_v13, %v323_v12  ;;  %v250_v16 = vadd.f32 %v374_v14, %v323_v12  ;;  %v209_v17 = vpop.f32.mrb[1].mxu0  ;;  %v241_v18 = vpop.f32.mrb[1].mxu1 }
 0x11d   :  { %v210_v19 = vadd.f32 %v323_v12, %v209_v17  ;;  %v242_v20 = vadd.f32 %v323_v12, %v241_v18  ;;  %v367_v21 = vpop.f32.mrb[2].mxu0  ;;  %v375_v22 = vpop.f32.mrb[2].mxu1 }
 0x11e   :  { %v274_v23 = vmax.f32 %v218_v15, 0.0  ;;  %v282_v24 = vmax.f32 %v250_v16, 0.0  ;;  %v221_v25 = vadd.f32 %v367_v21, %v323_v12  ;;  %v253_v26 = vadd.f32 %v375_v22, %v323_v12  ;;  %v212_v27 = vpop.f32.mrb[3].mxu0  ;;  %v244_v28 = vpop.f32.mrb[3].mxu1 }
 0x11f   :  { %v272_v29 = vmax.f32 %v210_v19, 0.0  ;;  %v280_v30 = vmax.f32 %v242_v20, 0.0  ;;  %v213_v31 = vadd.f32 %v323_v12, %v212_v27  ;;  %v245_v32 = vadd.f32 %v323_v12, %v244_v28 }
 0x120   :  { %291 = vst.msk [vmem:[#allocation8 + $0x10] sm:$0xff] %vm288_vm1, %v274_v23  ;;  %299 = vst.msk [vmem:[#allocation8 + $0x50] sm:$0xff] %vm288_vm1, %v282_v24  ;;  %v275_v33 = vmax.f32 %v221_v25, 0.0  ;;  %v283_v34 = vmax.f32 %v253_v26, 0.0 }
 0x121   :  { %289 = vst.msk [vmem:[#allocation8] sm:$0xff] %vm288_vm1, %v272_v29  ;;  %297 = vst.msk [vmem:[#allocation8 + $0x40] sm:$0xff] %vm288_vm1, %v280_v30  ;;  %v273_v35 = vmax.f32 %v213_v31, 0.0  ;;  %v281_v36 = vmax.f32 %v245_v32, 0.0 }
 0x122   :  { %292 = vst.msk [vmem:[#allocation8 + $0x18] sm:$0xff] %vm288_vm1, %v275_v33  ;;  %300 = vst.msk [vmem:[#allocation8 + $0x58] sm:$0xff] %vm288_vm1, %v283_v34 }
 0x123   :  { %290 = vst.msk [vmem:[#allocation8 + $0x8] sm:$0xff] %vm288_vm1, %v273_v35  ;;  %298 = vst.msk [vmem:[#allocation8 + $0x48] sm:$0xff] %vm288_vm1, %v281_v36  ;;  %v370_v37 = vpop.f32.mrb[4].mxu0  ;;  %v378_v38 = vpop.f32.mrb[4].mxu1 }
 0x124   :  { %v234_v39 = vadd.f32 %v370_v37, %v323_v12  ;;  %v266_v40 = vadd.f32 %v378_v38, %v323_v12  ;;  %v225_v41 = vpop.f32.mrb[5].mxu0  ;;  %v257_v42 = vpop.f32.mrb[5].mxu1 }
 0x125   :  { %v226_v43 = vadd.f32 %v323_v12, %v225_v41  ;;  %v258_v44 = vadd.f32 %v323_v12, %v257_v42  ;;  %v371_v45 = vpop.f32.mrb[6].mxu0  ;;  %v379_v46 = vpop.f32.mrb[6].mxu1 }
 0x126   :  { %v278_v47 = vmax.f32 %v234_v39, 0.0  ;;  %v286_v48 = vmax.f32 %v266_v40, 0.0  ;;  %v237_v49 = vadd.f32 %v371_v45, %v323_v12  ;;  %v269_v50 = vadd.f32 %v379_v46, %v323_v12  ;;  %v228_v51 = vpop.f32.mrb[7].mxu0  ;;  %v260_v52 = vpop.f32.mrb[7].mxu1 }
 0x127   :  { %v276_v53 = vmax.f32 %v226_v43, 0.0  ;;  %v284_v54 = vmax.f32 %v258_v44, 0.0  ;;  %v229_v55 = vadd.f32 %v323_v12, %v228_v51  ;;  %v261_v56 = vadd.f32 %v323_v12, %v260_v52 }
 0x128   :  { %295 = vst.msk [vmem:[#allocation8 + $0x30] sm:$0xff] %vm288_vm1, %v278_v47  ;;  %303 = vst.msk [vmem:[#allocation8 + $0x70] sm:$0xff] %vm288_vm1, %v286_v48  ;;  %v279_v57 = vmax.f32 %v237_v49, 0.0  ;;  %v287_v58 = vmax.f32 %v269_v50, 0.0 }
 0x129   :  { %293 = vst.msk [vmem:[#allocation8 + $0x20] sm:$0xff] %vm288_vm1, %v276_v53  ;;  %301 = vst.msk [vmem:[#allocation8 + $0x60] sm:$0xff] %vm288_vm1, %v284_v54  ;;  %v277_v59 = vmax.f32 %v229_v55, 0.0  ;;  %v285_v60 = vmax.f32 %v261_v56, 0.0 }
 0x12a   :  { %296 = vst.msk [vmem:[#allocation8 + $0x38] sm:$0xff] %vm288_vm1, %v279_v57  ;;  %304 = vst.msk [vmem:[#allocation8 + $0x78] sm:$0xff] %vm288_vm1, %v287_v58 }
 0x12b   :  { %294 = vst.msk [vmem:[#allocation8 + $0x28] sm:$0xff] %vm288_vm1, %v277_v59  ;;  %302 = vst.msk [vmem:[#allocation8 + $0x68] sm:$0xff] %vm288_vm1, %v285_v60 }
 0x12c   :  { %485 = shalt.err (!%p482_p0)
}
 0x12d   :  { %s486_s26 = scalar_lea.hbm %s612_s3, 2048 }
 0x12e   :  { %p487_p1 = scmp.ne.s32.totalorder %s612_s3, %s486_s26  ;;  %p490_p2 = scmp.lt.u32.totalorder %s486_s26, %s612_s3 }
 0x130   :  { %p492_p3 = pnand %p490_p2, %p487_p1 }
 0x132   :  { %495 = shalt.err (!%p492_p3)
}
 0x133   :  { %s508_s4 = smov 128   ;;  %s509_s5 = smov 8  }
 0x134   :  { %316 = dma.vmem_to_hbm [thread:$0]  %s311_s22, 2048, %s612_s3, [#allocation4], %s508_s4, %s508_s4, %s509_s5  }
 0x135   :  { %500 = dma.done.wait [#allocation4], 2048  }
 0x136   :  { %501 = vsyncadd [#allocation4], 4294965248 }
 0x137   :  { %320 = vsyncpa [#allocation3], 1 }
 0x138   :  { %321 = vsyncpa [#allocation6], 1 }
 0x139   :  { %322 = vsyncpa [#allocation4], 1 }

</bundles_post_ra>
